<compile_context>
chip_gen: v7x
topology: tpu7x:2x2x1
jax: 0.10.0
libtpu: 0.0.40
codegen_flags: <defaults>
</compile_context>

<pallas_src>
import math
import jax
import jax.numpy as jnp
from jax.experimental import pallas as pl
from jax.experimental.pallas import tpu as pltpu

NUM_HEADS = 4
PAD_IDX, START_IDX, END_IDX = 0, 1, 2


# ----------------------------------------------------------------------------
# Kernel 1: attention + final-feature embed + LSTM decoder -> hidden history
# ----------------------------------------------------------------------------
def recurrent_kernel(entity_ref, neigh_ref, nnum_ref, img_ref, x_ref,
                     wq_ref, bq_ref, wkv_ref, bkv_ref, wo_ref, bo_ref,
                     wimg_ref, bimg_ref, wih_ref, whh_ref, bg_ref,
                     h_all_ref):
    B, IH = entity_ref.shape
    N = neigh_ref.shape[0] // B
    TB = x_ref.shape[0]
    Tm1 = TB // B
    G = whh_ref.shape[0]
    dh = IH // NUM_HEADS
    scale = 1.0 / math.sqrt(dh)
    bf = jnp.bfloat16

    entity = entity_ref[...]                                   # [B, IH] bf16
    img = img_ref[...]                                         # [B, IH] bf16

    # attention mask built in-kernel from neighbor counts (int32 [B,1] input)
    pos = jax.lax.broadcasted_iota(jnp.int32, (B, N), 1)
    pad_mask = (pos >= nnum_ref[...])[:, None, :]              # [B, 1, N] bool

    # ---- MHA projections: single 2-D bf16 MXU matmuls, f32 accumulation ----
    q = jnp.dot(entity, wq_ref[...],
                preferred_element_type=jnp.float32) + bq_ref[...]          # [B, IH]
    kv = jnp.dot(neigh_ref[...], wkv_ref[...],
                 preferred_element_type=jnp.float32) + bkv_ref[...]        # [B*N, 2IH]
    kv3 = kv.reshape(B, N, 2 * IH)                                         # f32
    q3 = q[:, None, :]                                                     # [B, 1, IH]

    # per-head attention via contiguous lane slices + flash-style dot_generals
    # (scores / softmax kept in f32; heads are a tiny static unroll of 4)
    ctx_heads = []
    for h in range(NUM_HEADS):
        lo = h * dh
        q_h = q3[:, :, lo:lo + dh]                             # [B, 1, dh]
        k_h = kv3[:, :, lo:lo + dh]                            # [B, N, dh]
        v_h = kv3[:, :, IH + lo:IH + lo + dh]                  # [B, N, dh]
        s = jnp.einsum('bqd,bnd->bqn', q_h, k_h,
                       preferred_element_type=jnp.float32) * scale         # [B, 1, N]
        s = jnp.where(pad_mask, -1e30, s)
        s = s - jnp.max(s, axis=-1, keepdims=True)
        p = jnp.exp(s)
        p = p * pl.reciprocal(jnp.sum(p, axis=-1, keepdims=True), approx=True)
        ctx_heads.append(jnp.einsum('bqn,bnd->bqd', p, v_h,
                                    preferred_element_type=jnp.float32))   # [B, 1, dh]
    ctx = jnp.concatenate(ctx_heads, axis=-1)[:, 0, :]                     # [B, IH] f32
    attended = jnp.dot(ctx.astype(bf), wo_ref[...],
                       preferred_element_type=jnp.float32) + bo_ref[...]   # [B, IH] f32

    # ---- final feature -> img_embed: one fused K=3*IH matmul (lane concat) ----
    final_feat = jnp.concatenate([entity, attended.astype(bf), img], axis=-1)  # [B, 3IH]
    img_embed = jnp.tanh(
        jnp.dot(final_feat, wimg_ref[...],
                preferred_element_type=jnp.float32) + bimg_ref[...])       # [B, E] f32

    # ---- LSTM decoder ----
    w_ih = wih_ref[...]                                        # [E, 4G] bf16
    w_hh = whh_ref[...]                                        # [G, 4G] bf16
    b_g = bg_ref[...]                                          # [1, 4G] f32 (b_ih + b_hh)

    def gates_to_hc(gates, c_prev):
        # one full-width sigmoid pass + one tanh on the g slice
        sig = jax.nn.sigmoid(gates)                            # [B, 4G]
        i = sig[:, 0 * G:1 * G]
        f = sig[:, 1 * G:2 * G]
        o = sig[:, 3 * G:4 * G]
        g = jnp.tanh(gates[:, 2 * G:3 * G])
        c_new = f * c_prev + i * g
        return o * jnp.tanh(c_new), c_new

    # initial step: h, c = lstm_cell(img_embed) with zero state
    gates0 = jnp.dot(img_embed.astype(bf), w_ih,
                     preferred_element_type=jnp.float32) + b_g
    h, c = gates_to_hc(gates0, jnp.zeros((B, G), jnp.float32))

    # hoisted non-recurrent input projection: one [(T-1)*B, E] x [E, 4G] matmul
    xg = jnp.dot(x_ref[...], w_ih, preferred_element_type=jnp.float32) + b_g   # [(T-1)*B, 4G]

    # fully-unrolled recurrence: only h @ W_hh is on the serial path; hidden
    # history stays in vregs (no VMEM scratch round-trip).
    # TODO(synk): for long sequences (T > ~16) switch to lax.fori_loop with a
    # [(T-1)*B, G] VMEM scratch and pl.ds stores to cap vreg pressure.
    h_list = []
    for t in range(Tm1):
        gates = xg[t * B:(t + 1) * B, :] + jnp.dot(
            h.astype(bf), w_hh, preferred_element_type=jnp.float32)
        h, c = gates_to_hc(gates, c)
        h_list.append(h)

    h_all_ref[...] = jnp.concatenate(h_list, axis=0).astype(h_all_ref.dtype)


# ----------------------------------------------------------------------------
# Kernel 2: output projection, tiled over a 128-padded vocab axis
# ----------------------------------------------------------------------------
def output_proj_kernel(h_ref, w_ref, b_ref, o_ref):
    o_ref[...] = (jnp.dot(h_ref[...], w_ref[...],
                          preferred_element_type=jnp.float32) + b_ref[...])


def run_recurrent(kp, entity_bf, neigh2_bf, nnum2, img_bf, x2_bf):
    TB = x2_bf.shape[0]
    G = kp['w_hh'].shape[0]
    return pl.pallas_call(
        recurrent_kernel,
        out_shape=jax.ShapeDtypeStruct((TB, G), jnp.bfloat16),
    )(entity_bf, neigh2_bf, nnum2, img_bf, x2_bf,
      kp['wq'], kp['bq2'], kp['wkv'], kp['bkv2'], kp['wo'], kp['bo2'],
      kp['w_img'], kp['b_img2'], kp['w_ih'], kp['w_hh'], kp['b_gate'])


def run_output_proj(h_all, w_out_p, b_out_p):
    M, G = h_all.shape
    Vp = w_out_p.shape[1]
    tv = next(c for c in (1024, 512, 256, 128) if Vp % c == 0)
    return pl.pallas_call(
        output_proj_kernel,
        out_shape=jax.ShapeDtypeStruct((M, Vp), jnp.float32),
        grid_spec=pltpu.PrefetchScalarGridSpec(
            num_scalar_prefetch=0,
            grid=(Vp // tv,),
            in_specs=[pl.BlockSpec((M, G), lambda j: (0, 0)),
                      pl.BlockSpec((G, tv), lambda j: (0, j)),
                      pl.BlockSpec((1, tv), lambda j: (0, j))],
            out_specs=pl.BlockSpec((M, tv), lambda j: (0, j))),
        compiler_params=pltpu.CompilerParams(
            dimension_semantics=("parallel",)),
    )(h_all, w_out_p, b_out_p)


# ----------------------------------------------------------------------------
# Wrapper: teacher-forcing branch of generator.forward (fix_seq_len == -1)
# ----------------------------------------------------------------------------
def generator_forward(kp, entity_feature, neighbor_feature, neighbor_num,
                      img_feature, target_sent, target_sent_len):
    B, N, IH = neighbor_feature.shape
    T = target_sent.shape[1]
    V = kp['embedding'].shape[0]
    bf = jnp.bfloat16

    # embedding lookup, time-major, collapsed to 2-D (glue: plain JAX gather)
    x_tm = kp['embedding'][jnp.transpose(target_sent[:, :T - 1])]          # [T-1, B, E]
    x2 = x_tm.reshape((T - 1) * B, -1).astype(bf)                          # [(T-1)*B, E]

    entity_bf = entity_feature.astype(bf)
    img_bf = img_feature.astype(bf)
    neigh2_bf = neighbor_feature.reshape(B * N, IH).astype(bf)             # collapsed
    nnum2 = neighbor_num.reshape(B, 1).astype(jnp.int32)

    h_all = run_recurrent(kp, entity_bf, neigh2_bf, nnum2, img_bf, x2)     # [(T-1)*B, G]
    logits = run_output_proj(h_all, kp['w_out_p'], kp['b_out_p'])          # [(T-1)*B, Vp]

    logits = logits[:, :V].reshape(T - 1, B, V)
    pred_words_probs = jnp.transpose(logits, (1, 0, 2))                    # [B, T-1, V]

    sampled_sent = target_sent
    sampled_sent_len = target_sent_len.reshape(-1)
    return pred_words_probs, sampled_sent, sampled_sent_len


# ----------------------------------------------------------------------------
# Pure-JAX reference (full f32 weights) for verification
# ----------------------------------------------------------------------------
def reference_forward(p, entity, neigh, neighbor_num, img, target_sent):
    B, N, H = neigh.shape
    dh = H // NUM_HEADS
    pos = jnp.arange(N)[None, :]
    mask = (pos >= neighbor_num[:, None]).astype(jnp.float32)

    q = entity @ p['wq'] + p['bq']
    k = neigh @ p['wk'] + p['bk']
    v = neigh @ p['wv'] + p['bv']
    qh = q.reshape(B, NUM_HEADS, dh)
    kh = k.reshape(B, N, NUM_HEADS, dh)
    vh = v.reshape(B, N, NUM_HEADS, dh)
    s = jnp.einsum('bhd,bnhd->bhn', qh, kh) / math.sqrt(dh)
    s = jnp.where(mask[:, None, :] > 0.5, -1e30, s)
    pa = jax.nn.softmax(s, axis=-1)
    ctx = jnp.einsum('bhn,bnhd->bhd', pa, vh).reshape(B, H)
    attended = ctx @ p['wo'] + p['bo']

    final_feature = jnp.concatenate([entity, attended, img], axis=-1)
    img_embed = jnp.tanh(final_feature @ p['w_img'] + p['b_img'])

    G = p['w_hh'].shape[0]

    def lstm(x, h, c):
        gates = x @ p['w_ih'] + h @ p['w_hh'] + p['b_ih'] + p['b_hh']
        i = jax.nn.sigmoid(gates[:, :G])
        f = jax.nn.sigmoid(gates[:, G:2 * G])
        g = jnp.tanh(gates[:, 2 * G:3 * G])
        o = jax.nn.sigmoid(gates[:, 3 * G:])
        c_new = f * c + i * g
        return o * jnp.tanh(c_new), c_new

    h, c = lstm(img_embed, jnp.zeros((B, G)), jnp.zeros((B, G)))
    emb = p['embedding'][target_sent]
    preds = []
    for t in range(target_sent.shape[1] - 1):
        h, c = lstm(emb[:, t, :], h, c)
        preds.append(h @ p['w_out'] + p['b_out'])
    return jnp.stack(preds, axis=1)


# ----------------------------------------------------------------------------
# Deterministic parameter construction
# ----------------------------------------------------------------------------
def init_params(key, V, E, G, IH):
    ks = jax.random.split(key, 17)
    s = 0.1
    p = {
        'embedding': (jax.random.normal(ks[0], (V, E)) * s).at[PAD_IDX].set(0.0),
        'wq': jax.random.normal(ks[1], (IH, IH)) * s,
        'bq': jax.random.normal(ks[2], (IH,)) * s,
        'wk': jax.random.normal(ks[3], (IH, IH)) * s,
        'bk': jax.random.normal(ks[4], (IH,)) * s,
        'wv': jax.random.normal(ks[5], (IH, IH)) * s,
        'bv': jax.random.normal(ks[6], (IH,)) * s,
        'wo': jax.random.normal(ks[7], (IH, IH)) * s,
        'bo': jax.random.normal(ks[8], (IH,)) * s,
        'w_img': jax.random.normal(ks[9], (3 * IH, E)) * s,
        'b_img': jax.random.normal(ks[10], (E,)) * s,
        'w_ih': jax.random.normal(ks[11], (E, 4 * G)) * s,
        'w_hh': jax.random.normal(ks[12], (G, 4 * G)) * s,
        'b_ih': jax.random.normal(ks[13], (4 * G,)) * s,
        'b_hh': jax.random.normal(ks[14], (4 * G,)) * s,
        'w_out': jax.random.normal(ks[15], (G, V)) * s,
        'b_out': jax.random.normal(ks[16], (V,)) * s,
    }
    bf = jnp.bfloat16
    V_pad = ((V + 127) // 128) * 128          # 128-lane padded vocab for dense stores
    kp = {
        'embedding': p['embedding'],
        'wq': p['wq'].astype(bf),
        'bq2': p['bq'].reshape(1, IH),
        'wkv': jnp.concatenate([p['wk'], p['wv']], axis=1).astype(bf),     # [IH, 2IH]
        'bkv2': jnp.concatenate([p['bk'], p['bv']]).reshape(1, 2 * IH),
        'wo': p['wo'].astype(bf),
        'bo2': p['bo'].reshape(1, IH),
        'w_img': p['w_img'].astype(bf),                                    # [3IH, E] fused
        'b_img2': p['b_img'].reshape(1, E),
        'w_ih': p['w_ih'].astype(bf),                                      # [E, 4G]
        'w_hh': p['w_hh'].astype(bf),                                      # [G, 4G]
        'b_gate': (p['b_ih'] + p['b_hh']).reshape(1, 4 * G),
        'w_out_p': jnp.zeros((G, V_pad), bf).at[:, :V].set(p['w_out'].astype(bf)),
        'b_out_p': jnp.zeros((1, V_pad), jnp.float32).at[:, :V].set(p['b_out']),
    }
    return p, kp


if __name__ == "__main__":
    B, T, V, E, G, IH, Nmax = 2, 8, 64, 32, 32, 32, 3

    key = jax.random.PRNGKey(0)
    k_par, k_ent, k_nei, k_img, k_sent = jax.random.split(key, 5)

    full_params, kernel_params = init_params(k_par, V, E, G, IH)

    entity_feature = jax.random.normal(k_ent, (B, IH), jnp.float32)
    img_feature = jax.random.normal(k_img, (B, IH), jnp.float32)

    # neighbor_feature_list -> padded tensor + lengths (pad_sequence semantics)
    neighbor_num = jnp.array([3, 2], jnp.int32)
    neigh_raw = jax.random.normal(k_nei, (B, Nmax, IH), jnp.float32)
    valid = (jnp.arange(Nmax)[None, :] < neighbor_num[:, None]).astype(jnp.float32)
    neighbor_feature = neigh_raw * valid[:, :, None]

    target_sent = jax.random.randint(k_sent, (B, T), 3, V).astype(jnp.int32)
    target_sent = target_sent.at[:, 0].set(START_IDX).at[:, -1].set(END_IDX)
    target_sent_len = jnp.array([T, T], jnp.int32)

    # TODO(synk): the multinomial-sampling / early-stop free-running branch and
    # dropout randomness are host-side / stochastic and are not ported.

    pred, sampled_sent, sampled_len = generator_forward(
        kernel_params, entity_feature, neighbor_feature, neighbor_num,
        img_feature, target_sent, target_sent_len)
    jax.block_until_ready(pred)

    ref = reference_forward(full_params, entity_feature, neighbor_feature,
                            neighbor_num, img_feature, target_sent)

    assert pred.shape == (B, T - 1, V), pred.shape
    assert sampled_sent.shape == (B, T)
    assert sampled_len.shape == (B,)
    # tolerance accounts for bf16 weight matmuls (f32 accumulation / softmax / gates)
    assert jnp.allclose(pred, ref, atol=3e-2, rtol=3e-2), \
        float(jnp.max(jnp.abs(pred - ref)))

    print("KERNEL_OK")
</pallas_src>

<mosaic_0001>
module attributes {stable_mosaic.version = 11 : i64} {
  func.func @recurrent_kernel(%arg0: memref<2x32xbf16, #tpu.memory_space<vmem>>, %arg1: memref<6x32xbf16, #tpu.memory_space<vmem>>, %arg2: memref<2x1xi32, #tpu.memory_space<vmem>>, %arg3: memref<2x32xbf16, #tpu.memory_space<vmem>>, %arg4: memref<14x32xbf16, #tpu.memory_space<vmem>>, %arg5: memref<32x32xbf16, #tpu.memory_space<vmem>>, %arg6: memref<1x32xf32, #tpu.memory_space<vmem>>, %arg7: memref<32x64xbf16, #tpu.memory_space<vmem>>, %arg8: memref<1x64xf32, #tpu.memory_space<vmem>>, %arg9: memref<32x32xbf16, #tpu.memory_space<vmem>>, %arg10: memref<1x32xf32, #tpu.memory_space<vmem>>, %arg11: memref<96x32xbf16, #tpu.memory_space<vmem>>, %arg12: memref<1x32xf32, #tpu.memory_space<vmem>>, %arg13: memref<32x128xbf16, #tpu.memory_space<vmem>>, %arg14: memref<32x128xbf16, #tpu.memory_space<vmem>>, %arg15: memref<1x128xf32, #tpu.memory_space<vmem>>, %arg16: memref<14x32xbf16, #tpu.memory_space<vmem>>) attributes {dimension_semantics = [], scalar_prefetch = 0 : i64, scratch_operands = 0 : i64, tpu.core_type = #tpu.core_type<tc>} {
    %c0 = arith.constant 0 : index
    %c0_0 = arith.constant 0 : index
    %0 = vector.load %arg0[%c0, %c0_0] : memref<2x32xbf16, #tpu.memory_space<vmem>>, vector<2x32xbf16>
    %c0_1 = arith.constant 0 : index
    %c0_2 = arith.constant 0 : index
    %1 = vector.load %arg3[%c0_1, %c0_2] : memref<2x32xbf16, #tpu.memory_space<vmem>>, vector<2x32xbf16>
    %2 = tpu.iota {dimensions = array<i32: 1>} : vector<2x3xi32>
    %c0_3 = arith.constant 0 : index
    %c0_4 = arith.constant 0 : index
    %3 = vector.load %arg2[%c0_3, %c0_4] : memref<2x1xi32, #tpu.memory_space<vmem>>, vector<2x1xi32>
    %4 = vector.broadcast %3 : vector<2x1xi32> to vector<2x3xi32>
    %5 = arith.cmpi sge, %2, %4 : vector<2x3xi32>
    %6 = vector.shape_cast %5 : vector<2x3xi1> to vector<2x1x3xi1>
    %c0_5 = arith.constant 0 : index
    %c0_6 = arith.constant 0 : index
    %7 = vector.load %arg5[%c0_5, %c0_6] : memref<32x32xbf16, #tpu.memory_space<vmem>>, vector<32x32xbf16>
    %cst = arith.constant dense<0.000000e+00> : vector<2x32xf32>
    %8 = tpu.matmul %0, %7, %cst {dimension_numbers = #tpu.dot_dimension_numbers<[1], [0], [0], [1], [0, 0, 1, 1], [], []>} : vector<2x32xbf16>, vector<32x32xbf16>, vector<2x32xf32> -> vector<2x32xf32>
    %c0_7 = arith.constant 0 : index
    %c0_8 = arith.constant 0 : index
    %9 = vector.load %arg6[%c0_7, %c0_8] : memref<1x32xf32, #tpu.memory_space<vmem>>, vector<1x32xf32>
    %10 = vector.broadcast %9 : vector<1x32xf32> to vector<2x32xf32>
    %11 = arith.addf %8, %10 : vector<2x32xf32>
    %c0_9 = arith.constant 0 : index
    %c0_10 = arith.constant 0 : index
    %12 = vector.load %arg1[%c0_9, %c0_10] : memref<6x32xbf16, #tpu.memory_space<vmem>>, vector<6x32xbf16>
    %c0_11 = arith.constant 0 : index
    %c0_12 = arith.constant 0 : index
    %13 = vector.load %arg7[%c0_11, %c0_12] : memref<32x64xbf16, #tpu.memory_space<vmem>>, vector<32x64xbf16>
    %cst_13 = arith.constant dense<0.000000e+00> : vector<6x64xf32>
    %14 = tpu.matmul %12, %13, %cst_13 {dimension_numbers = #tpu.dot_dimension_numbers<[1], [0], [0], [1], [0, 0, 1, 1], [], []>} : vector<6x32xbf16>, vector<32x64xbf16>, vector<6x64xf32> -> vector<6x64xf32>
    %c0_14 = arith.constant 0 : index
    %c0_15 = arith.constant 0 : index
    %15 = vector.load %arg8[%c0_14, %c0_15] : memref<1x64xf32, #tpu.memory_space<vmem>>, vector<1x64xf32>
    %16 = vector.broadcast %15 : vector<1x64xf32> to vector<6x64xf32>
    %17 = arith.addf %14, %16 : vector<6x64xf32>
    %18 = vector.shape_cast %17 : vector<6x64xf32> to vector<2x3x64xf32>
    %19 = vector.shape_cast %11 : vector<2x32xf32> to vector<2x1x32xf32>
    %20 = vector.extract_strided_slice %19 {offsets = [0, 0, 0], sizes = [2, 1, 8], strides = [1, 1, 1]} : vector<2x1x32xf32> to vector<2x1x8xf32>
    %21 = vector.extract_strided_slice %18 {offsets = [0, 0, 0], sizes = [2, 3, 8], strides = [1, 1, 1]} : vector<2x3x64xf32> to vector<2x3x8xf32>
    %22 = vector.extract_strided_slice %18 {offsets = [0, 0, 32], sizes = [2, 3, 8], strides = [1, 1, 1]} : vector<2x3x64xf32> to vector<2x3x8xf32>
    "tpu.trace_start"() <{level = 10 : i32, message = "bqd,bnd->bqn"}> : () -> ()
    %cst_16 = arith.constant dense<0.000000e+00> : vector<2x1x3xf32>
    %23 = tpu.matmul %20, %21, %cst_16 {dimension_numbers = #tpu.dot_dimension_numbers<[2], [2], [1], [1], [0, 0, 0, 1, 1, 1], [0], [0]>} : vector<2x1x8xf32>, vector<2x3x8xf32>, vector<2x1x3xf32> -> vector<2x1x3xf32>
    "tpu.trace_stop"() : () -> ()
    %cst_17 = arith.constant 0.353553385 : f32
    %24 = vector.broadcast %cst_17 : f32 to vector<2x1x3xf32>
    %25 = arith.mulf %23, %24 : vector<2x1x3xf32>
    %cst_18 = arith.constant -1.000000e+30 : f32
    %26 = vector.broadcast %cst_18 : f32 to vector<2x1x3xf32>
    %27 = arith.select %6, %26, %25 : vector<2x1x3xi1>, vector<2x1x3xf32>
    %cst_19 = arith.constant dense<0xFF800000> : vector<2x1xf32>
    %28 = vector.multi_reduction <maximumf>, %27, %cst_19 [2] : vector<2x1x3xf32> to vector<2x1xf32>
    %29 = vector.shape_cast %28 : vector<2x1xf32> to vector<2x1x1xf32>
    %30 = vector.broadcast %29 : vector<2x1x1xf32> to vector<2x1x3xf32>
    %31 = arith.subf %27, %30 : vector<2x1x3xf32>
    %32 = math.exp %31 : vector<2x1x3xf32>
    %cst_20 = arith.constant dense<0.000000e+00> : vector<2x1xf32>
    %33 = vector.multi_reduction <add>, %32, %cst_20 [2] : vector<2x1x3xf32> to vector<2x1xf32>
    %34 = vector.shape_cast %33 : vector<2x1xf32> to vector<2x1x1xf32>
    %35 = tpu.reciprocal %34 {approx = true} : vector<2x1x1xf32> -> vector<2x1x1xf32>
    %36 = vector.broadcast %35 : vector<2x1x1xf32> to vector<2x1x3xf32>
    %37 = arith.mulf %32, %36 : vector<2x1x3xf32>
    "tpu.trace_start"() <{level = 10 : i32, message = "bqn,bnd->bqd"}> : () -> ()
    %cst_21 = arith.constant dense<0.000000e+00> : vector<2x1x8xf32>
    %38 = tpu.matmul %37, %22, %cst_21 {dimension_numbers = #tpu.dot_dimension_numbers<[2], [1], [1], [2], [0, 0, 0, 1, 1, 2], [0], [0]>} : vector<2x1x3xf32>, vector<2x3x8xf32>, vector<2x1x8xf32> -> vector<2x1x8xf32>
    "tpu.trace_stop"() : () -> ()
    %39 = vector.extract_strided_slice %19 {offsets = [0, 0, 8], sizes = [2, 1, 8], strides = [1, 1, 1]} : vector<2x1x32xf32> to vector<2x1x8xf32>
    %40 = vector.extract_strided_slice %18 {offsets = [0, 0, 8], sizes = [2, 3, 8], strides = [1, 1, 1]} : vector<2x3x64xf32> to vector<2x3x8xf32>
    %41 = vector.extract_strided_slice %18 {offsets = [0, 0, 40], sizes = [2, 3, 8], strides = [1, 1, 1]} : vector<2x3x64xf32> to vector<2x3x8xf32>
    "tpu.trace_start"() <{level = 10 : i32, message = "bqd,bnd->bqn"}> : () -> ()
    %cst_22 = arith.constant dense<0.000000e+00> : vector<2x1x3xf32>
    %42 = tpu.matmul %39, %40, %cst_22 {dimension_numbers = #tpu.dot_dimension_numbers<[2], [2], [1], [1], [0, 0, 0, 1, 1, 1], [0], [0]>} : vector<2x1x8xf32>, vector<2x3x8xf32>, vector<2x1x3xf32> -> vector<2x1x3xf32>
    "tpu.trace_stop"() : () -> ()
    %cst_23 = arith.constant 0.353553385 : f32
    %43 = vector.broadcast %cst_23 : f32 to vector<2x1x3xf32>
    %44 = arith.mulf %42, %43 : vector<2x1x3xf32>
    %cst_24 = arith.constant -1.000000e+30 : f32
    %45 = vector.broadcast %cst_24 : f32 to vector<2x1x3xf32>
    %46 = arith.select %6, %45, %44 : vector<2x1x3xi1>, vector<2x1x3xf32>
    %cst_25 = arith.constant dense<0xFF800000> : vector<2x1xf32>
    %47 = vector.multi_reduction <maximumf>, %46, %cst_25 [2] : vector<2x1x3xf32> to vector<2x1xf32>
    %48 = vector.shape_cast %47 : vector<2x1xf32> to vector<2x1x1xf32>
    %49 = vector.broadcast %48 : vector<2x1x1xf32> to vector<2x1x3xf32>
    %50 = arith.subf %46, %49 : vector<2x1x3xf32>
    %51 = math.exp %50 : vector<2x1x3xf32>
    %cst_26 = arith.constant dense<0.000000e+00> : vector<2x1xf32>
    %52 = vector.multi_reduction <add>, %51, %cst_26 [2] : vector<2x1x3xf32> to vector<2x1xf32>
    %53 = vector.shape_cast %52 : vector<2x1xf32> to vector<2x1x1xf32>
    %54 = tpu.reciprocal %53 {approx = true} : vector<2x1x1xf32> -> vector<2x1x1xf32>
    %55 = vector.broadcast %54 : vector<2x1x1xf32> to vector<2x1x3xf32>
    %56 = arith.mulf %51, %55 : vector<2x1x3xf32>
    "tpu.trace_start"() <{level = 10 : i32, message = "bqn,bnd->bqd"}> : () -> ()
    %cst_27 = arith.constant dense<0.000000e+00> : vector<2x1x8xf32>
    %57 = tpu.matmul %56, %41, %cst_27 {dimension_numbers = #tpu.dot_dimension_numbers<[2], [1], [1], [2], [0, 0, 0, 1, 1, 2], [0], [0]>} : vector<2x1x3xf32>, vector<2x3x8xf32>, vector<2x1x8xf32> -> vector<2x1x8xf32>
    "tpu.trace_stop"() : () -> ()
    %58 = vector.extract_strided_slice %19 {offsets = [0, 0, 16], sizes = [2, 1, 8], strides = [1, 1, 1]} : vector<2x1x32xf32> to vector<2x1x8xf32>
    %59 = vector.extract_strided_slice %18 {offsets = [0, 0, 16], sizes = [2, 3, 8], strides = [1, 1, 1]} : vector<2x3x64xf32> to vector<2x3x8xf32>
    %60 = vector.extract_strided_slice %18 {offsets = [0, 0, 48], sizes = [2, 3, 8], strides = [1, 1, 1]} : vector<2x3x64xf32> to vector<2x3x8xf32>
    "tpu.trace_start"() <{level = 10 : i32, message = "bqd,bnd->bqn"}> : () -> ()
    %cst_28 = arith.constant dense<0.000000e+00> : vector<2x1x3xf32>
    %61 = tpu.matmul %58, %59, %cst_28 {dimension_numbers = #tpu.dot_dimension_numbers<[2], [2], [1], [1], [0, 0, 0, 1, 1, 1], [0], [0]>} : vector<2x1x8xf32>, vector<2x3x8xf32>, vector<2x1x3xf32> -> vector<2x1x3xf32>
    "tpu.trace_stop"() : () -> ()
    %cst_29 = arith.constant 0.353553385 : f32
    %62 = vector.broadcast %cst_29 : f32 to vector<2x1x3xf32>
    %63 = arith.mulf %61, %62 : vector<2x1x3xf32>
    %cst_30 = arith.constant -1.000000e+30 : f32
    %64 = vector.broadcast %cst_30 : f32 to vector<2x1x3xf32>
    %65 = arith.select %6, %64, %63 : vector<2x1x3xi1>, vector<2x1x3xf32>
    %cst_31 = arith.constant dense<0xFF800000> : vector<2x1xf32>
    %66 = vector.multi_reduction <maximumf>, %65, %cst_31 [2] : vector<2x1x3xf32> to vector<2x1xf32>
    %67 = vector.shape_cast %66 : vector<2x1xf32> to vector<2x1x1xf32>
    %68 = vector.broadcast %67 : vector<2x1x1xf32> to vector<2x1x3xf32>
    %69 = arith.subf %65, %68 : vector<2x1x3xf32>
    %70 = math.exp %69 : vector<2x1x3xf32>
    %cst_32 = arith.constant dense<0.000000e+00> : vector<2x1xf32>
    %71 = vector.multi_reduction <add>, %70, %cst_32 [2] : vector<2x1x3xf32> to vector<2x1xf32>
    %72 = vector.shape_cast %71 : vector<2x1xf32> to vector<2x1x1xf32>
    %73 = tpu.reciprocal %72 {approx = true} : vector<2x1x1xf32> -> vector<2x1x1xf32>
    %74 = vector.broadcast %73 : vector<2x1x1xf32> to vector<2x1x3xf32>
    %75 = arith.mulf %70, %74 : vector<2x1x3xf32>
    "tpu.trace_start"() <{level = 10 : i32, message = "bqn,bnd->bqd"}> : () -> ()
    %cst_33 = arith.constant dense<0.000000e+00> : vector<2x1x8xf32>
    %76 = tpu.matmul %75, %60, %cst_33 {dimension_numbers = #tpu.dot_dimension_numbers<[2], [1], [1], [2], [0, 0, 0, 1, 1, 2], [0], [0]>} : vector<2x1x3xf32>, vector<2x3x8xf32>, vector<2x1x8xf32> -> vector<2x1x8xf32>
    "tpu.trace_stop"() : () -> ()
    %77 = vector.extract_strided_slice %19 {offsets = [0, 0, 24], sizes = [2, 1, 8], strides = [1, 1, 1]} : vector<2x1x32xf32> to vector<2x1x8xf32>
    %78 = vector.extract_strided_slice %18 {offsets = [0, 0, 24], sizes = [2, 3, 8], strides = [1, 1, 1]} : vector<2x3x64xf32> to vector<2x3x8xf32>
    %79 = vector.extract_strided_slice %18 {offsets = [0, 0, 56], sizes = [2, 3, 8], strides = [1, 1, 1]} : vector<2x3x64xf32> to vector<2x3x8xf32>
    "tpu.trace_start"() <{level = 10 : i32, message = "bqd,bnd->bqn"}> : () -> ()
    %cst_34 = arith.constant dense<0.000000e+00> : vector<2x1x3xf32>
    %80 = tpu.matmul %77, %78, %cst_34 {dimension_numbers = #tpu.dot_dimension_numbers<[2], [2], [1], [1], [0, 0, 0, 1, 1, 1], [0], [0]>} : vector<2x1x8xf32>, vector<2x3x8xf32>, vector<2x1x3xf32> -> vector<2x1x3xf32>
    "tpu.trace_stop"() : () -> ()
    %cst_35 = arith.constant 0.353553385 : f32
    %81 = vector.broadcast %cst_35 : f32 to vector<2x1x3xf32>
    %82 = arith.mulf %80, %81 : vector<2x1x3xf32>
    %cst_36 = arith.constant -1.000000e+30 : f32
    %83 = vector.broadcast %cst_36 : f32 to vector<2x1x3xf32>
    %84 = arith.select %6, %83, %82 : vector<2x1x3xi1>, vector<2x1x3xf32>
    %cst_37 = arith.constant dense<0xFF800000> : vector<2x1xf32>
    %85 = vector.multi_reduction <maximumf>, %84, %cst_37 [2] : vector<2x1x3xf32> to vector<2x1xf32>
    %86 = vector.shape_cast %85 : vector<2x1xf32> to vector<2x1x1xf32>
    %87 = vector.broadcast %86 : vector<2x1x1xf32> to vector<2x1x3xf32>
    %88 = arith.subf %84, %87 : vector<2x1x3xf32>
    %89 = math.exp %88 : vector<2x1x3xf32>
    %cst_38 = arith.constant dense<0.000000e+00> : vector<2x1xf32>
    %90 = vector.multi_reduction <add>, %89, %cst_38 [2] : vector<2x1x3xf32> to vector<2x1xf32>
    %91 = vector.shape_cast %90 : vector<2x1xf32> to vector<2x1x1xf32>
    %92 = tpu.reciprocal %91 {approx = true} : vector<2x1x1xf32> -> vector<2x1x1xf32>
    %93 = vector.broadcast %92 : vector<2x1x1xf32> to vector<2x1x3xf32>
    %94 = arith.mulf %89, %93 : vector<2x1x3xf32>
    "tpu.trace_start"() <{level = 10 : i32, message = "bqn,bnd->bqd"}> : () -> ()
    %cst_39 = arith.constant dense<0.000000e+00> : vector<2x1x8xf32>
    %95 = tpu.matmul %94, %79, %cst_39 {dimension_numbers = #tpu.dot_dimension_numbers<[2], [1], [1], [2], [0, 0, 0, 1, 1, 2], [0], [0]>} : vector<2x1x3xf32>, vector<2x3x8xf32>, vector<2x1x8xf32> -> vector<2x1x8xf32>
    "tpu.trace_stop"() : () -> ()
    %96 = tpu.concatenate %38, %57, %76, %95 in 2 : vector<2x1x8xf32>, vector<2x1x8xf32>, vector<2x1x8xf32>, vector<2x1x8xf32> -> vector<2x1x32xf32>
    %97 = vector.shape_cast %96 : vector<2x1x32xf32> to vector<2x32xf32>
    %98 = arith.truncf %97 : vector<2x32xf32> to vector<2x32xbf16>
    %c0_40 = arith.constant 0 : index
    %c0_41 = arith.constant 0 : index
    %99 = vector.load %arg9[%c0_40, %c0_41] : memref<32x32xbf16, #tpu.memory_space<vmem>>, vector<32x32xbf16>
    %cst_42 = arith.constant dense<0.000000e+00> : vector<2x32xf32>
    %100 = tpu.matmul %98, %99, %cst_42 {dimension_numbers = #tpu.dot_dimension_numbers<[1], [0], [0], [1], [0, 0, 1, 1], [], []>} : vector<2x32xbf16>, vector<32x32xbf16>, vector<2x32xf32> -> vector<2x32xf32>
    %c0_43 = arith.constant 0 : index
    %c0_44 = arith.constant 0 : index
    %101 = vector.load %arg10[%c0_43, %c0_44] : memref<1x32xf32, #tpu.memory_space<vmem>>, vector<1x32xf32>
    %102 = vector.broadcast %101 : vector<1x32xf32> to vector<2x32xf32>
    %103 = arith.addf %100, %102 : vector<2x32xf32>
    %104 = arith.truncf %103 : vector<2x32xf32> to vector<2x32xbf16>
    %105 = tpu.concatenate %0, %104, %1 in 1 : vector<2x32xbf16>, vector<2x32xbf16>, vector<2x32xbf16> -> vector<2x96xbf16>
    %c0_45 = arith.constant 0 : index
    %c0_46 = arith.constant 0 : index
    %106 = vector.load %arg11[%c0_45, %c0_46] : memref<96x32xbf16, #tpu.memory_space<vmem>>, vector<96x32xbf16>
    %cst_47 = arith.constant dense<0.000000e+00> : vector<2x32xf32>
    %107 = tpu.matmul %105, %106, %cst_47 {dimension_numbers = #tpu.dot_dimension_numbers<[1], [0], [0], [1], [0, 0, 1, 1], [], []>} : vector<2x96xbf16>, vector<96x32xbf16>, vector<2x32xf32> -> vector<2x32xf32>
    %c0_48 = arith.constant 0 : index
    %c0_49 = arith.constant 0 : index
    %108 = vector.load %arg12[%c0_48, %c0_49] : memref<1x32xf32, #tpu.memory_space<vmem>>, vector<1x32xf32>
    %109 = vector.broadcast %108 : vector<1x32xf32> to vector<2x32xf32>
    %110 = arith.addf %107, %109 : vector<2x32xf32>
    %111 = math.tanh %110 : vector<2x32xf32>
    %c0_50 = arith.constant 0 : index
    %c0_51 = arith.constant 0 : index
    %112 = vector.load %arg13[%c0_50, %c0_51] : memref<32x128xbf16, #tpu.memory_space<vmem>>, vector<32x128xbf16>
    %c0_52 = arith.constant 0 : index
    %c0_53 = arith.constant 0 : index
    %113 = vector.load %arg14[%c0_52, %c0_53] : memref<32x128xbf16, #tpu.memory_space<vmem>>, vector<32x128xbf16>
    %c0_54 = arith.constant 0 : index
    %c0_55 = arith.constant 0 : index
    %114 = vector.load %arg15[%c0_54, %c0_55] : memref<1x128xf32, #tpu.memory_space<vmem>>, vector<1x128xf32>
    %115 = arith.truncf %111 : vector<2x32xf32> to vector<2x32xbf16>
    %cst_56 = arith.constant dense<0.000000e+00> : vector<2x128xf32>
    %116 = tpu.matmul %115, %112, %cst_56 {dimension_numbers = #tpu.dot_dimension_numbers<[1], [0], [0], [1], [0, 0, 1, 1], [], []>} : vector<2x32xbf16>, vector<32x128xbf16>, vector<2x128xf32> -> vector<2x128xf32>
    %117 = vector.broadcast %114 : vector<1x128xf32> to vector<2x128xf32>
    %118 = arith.addf %116, %117 : vector<2x128xf32>
    %cst_57 = arith.constant 0.000000e+00 : f32
    %119 = vector.broadcast %cst_57 : f32 to vector<2x32xf32>
    %120 = arith.negf %118 : vector<2x128xf32>
    %121 = math.exp %120 : vector<2x128xf32>
    %cst_58 = arith.constant 1.000000e+00 : f32
    %122 = vector.broadcast %cst_58 : f32 to vector<2x128xf32>
    %123 = arith.addf %122, %121 : vector<2x128xf32>
    %124 = arith.divf %122, %123 : vector<2x128xf32>
    %125 = vector.extract_strided_slice %124 {offsets = [0, 0], sizes = [2, 32], strides = [1, 1]} : vector<2x128xf32> to vector<2x32xf32>
    %126 = vector.extract_strided_slice %124 {offsets = [0, 32], sizes = [2, 32], strides = [1, 1]} : vector<2x128xf32> to vector<2x32xf32>
    %127 = vector.extract_strided_slice %124 {offsets = [0, 96], sizes = [2, 32], strides = [1, 1]} : vector<2x128xf32> to vector<2x32xf32>
    %128 = vector.extract_strided_slice %118 {offsets = [0, 64], sizes = [2, 32], strides = [1, 1]} : vector<2x128xf32> to vector<2x32xf32>
    %129 = math.tanh %128 : vector<2x32xf32>
    %130 = arith.mulf %126, %119 : vector<2x32xf32>
    %131 = arith.mulf %125, %129 : vector<2x32xf32>
    %132 = arith.addf %130, %131 : vector<2x32xf32>
    %133 = math.tanh %132 : vector<2x32xf32>
    %134 = arith.mulf %127, %133 : vector<2x32xf32>
    %c0_59 = arith.constant 0 : index
    %c0_60 = arith.constant 0 : index
    %135 = vector.load %arg4[%c0_59, %c0_60] : memref<14x32xbf16, #tpu.memory_space<vmem>>, vector<14x32xbf16>
    %cst_61 = arith.constant dense<0.000000e+00> : vector<14x128xf32>
    %136 = tpu.matmul %135, %112, %cst_61 {dimension_numbers = #tpu.dot_dimension_numbers<[1], [0], [0], [1], [0, 0, 1, 1], [], []>} : vector<14x32xbf16>, vector<32x128xbf16>, vector<14x128xf32> -> vector<14x128xf32>
    %137 = vector.broadcast %114 : vector<1x128xf32> to vector<14x128xf32>
    %138 = arith.addf %136, %137 : vector<14x128xf32>
    %139 = vector.extract_strided_slice %138 {offsets = [0, 0], sizes = [2, 128], strides = [1, 1]} : vector<14x128xf32> to vector<2x128xf32>
    %140 = arith.truncf %134 : vector<2x32xf32> to vector<2x32xbf16>
    %cst_62 = arith.constant dense<0.000000e+00> : vector<2x128xf32>
    %141 = tpu.matmul %140, %113, %cst_62 {dimension_numbers = #tpu.dot_dimension_numbers<[1], [0], [0], [1], [0, 0, 1, 1], [], []>} : vector<2x32xbf16>, vector<32x128xbf16>, vector<2x128xf32> -> vector<2x128xf32>
    %142 = arith.addf %139, %141 : vector<2x128xf32>
    %143 = arith.negf %142 : vector<2x128xf32>
    %144 = math.exp %143 : vector<2x128xf32>
    %cst_63 = arith.constant 1.000000e+00 : f32
    %145 = vector.broadcast %cst_63 : f32 to vector<2x128xf32>
    %146 = arith.addf %145, %144 : vector<2x128xf32>
    %147 = arith.divf %145, %146 : vector<2x128xf32>
    %148 = vector.extract_strided_slice %147 {offsets = [0, 0], sizes = [2, 32], strides = [1, 1]} : vector<2x128xf32> to vector<2x32xf32>
    %149 = vector.extract_strided_slice %147 {offsets = [0, 32], sizes = [2, 32], strides = [1, 1]} : vector<2x128xf32> to vector<2x32xf32>
    %150 = vector.extract_strided_slice %147 {offsets = [0, 96], sizes = [2, 32], strides = [1, 1]} : vector<2x128xf32> to vector<2x32xf32>
    %151 = vector.extract_strided_slice %142 {offsets = [0, 64], sizes = [2, 32], strides = [1, 1]} : vector<2x128xf32> to vector<2x32xf32>
    %152 = math.tanh %151 : vector<2x32xf32>
    %153 = arith.mulf %149, %132 : vector<2x32xf32>
    %154 = arith.mulf %148, %152 : vector<2x32xf32>
    %155 = arith.addf %153, %154 : vector<2x32xf32>
    %156 = math.tanh %155 : vector<2x32xf32>
    %157 = arith.mulf %150, %156 : vector<2x32xf32>
    %158 = vector.extract_strided_slice %138 {offsets = [2, 0], sizes = [2, 128], strides = [1, 1]} : vector<14x128xf32> to vector<2x128xf32>
    %159 = arith.truncf %157 : vector<2x32xf32> to vector<2x32xbf16>
    %cst_64 = arith.constant dense<0.000000e+00> : vector<2x128xf32>
    %160 = tpu.matmul %159, %113, %cst_64 {dimension_numbers = #tpu.dot_dimension_numbers<[1], [0], [0], [1], [0, 0, 1, 1], [], []>} : vector<2x32xbf16>, vector<32x128xbf16>, vector<2x128xf32> -> vector<2x128xf32>
    %161 = arith.addf %158, %160 : vector<2x128xf32>
    %162 = arith.negf %161 : vector<2x128xf32>
    %163 = math.exp %162 : vector<2x128xf32>
    %cst_65 = arith.constant 1.000000e+00 : f32
    %164 = vector.broadcast %cst_65 : f32 to vector<2x128xf32>
    %165 = arith.addf %164, %163 : vector<2x128xf32>
    %166 = arith.divf %164, %165 : vector<2x128xf32>
    %167 = vector.extract_strided_slice %166 {offsets = [0, 0], sizes = [2, 32], strides = [1, 1]} : vector<2x128xf32> to vector<2x32xf32>
    %168 = vector.extract_strided_slice %166 {offsets = [0, 32], sizes = [2, 32], strides = [1, 1]} : vector<2x128xf32> to vector<2x32xf32>
    %169 = vector.extract_strided_slice %166 {offsets = [0, 96], sizes = [2, 32], strides = [1, 1]} : vector<2x128xf32> to vector<2x32xf32>
    %170 = vector.extract_strided_slice %161 {offsets = [0, 64], sizes = [2, 32], strides = [1, 1]} : vector<2x128xf32> to vector<2x32xf32>
    %171 = math.tanh %170 : vector<2x32xf32>
    %172 = arith.mulf %168, %155 : vector<2x32xf32>
    %173 = arith.mulf %167, %171 : vector<2x32xf32>
    %174 = arith.addf %172, %173 : vector<2x32xf32>
    %175 = math.tanh %174 : vector<2x32xf32>
    %176 = arith.mulf %169, %175 : vector<2x32xf32>
    %177 = vector.extract_strided_slice %138 {offsets = [4, 0], sizes = [2, 128], strides = [1, 1]} : vector<14x128xf32> to vector<2x128xf32>
    %178 = arith.truncf %176 : vector<2x32xf32> to vector<2x32xbf16>
    %cst_66 = arith.constant dense<0.000000e+00> : vector<2x128xf32>
    %179 = tpu.matmul %178, %113, %cst_66 {dimension_numbers = #tpu.dot_dimension_numbers<[1], [0], [0], [1], [0, 0, 1, 1], [], []>} : vector<2x32xbf16>, vector<32x128xbf16>, vector<2x128xf32> -> vector<2x128xf32>
    %180 = arith.addf %177, %179 : vector<2x128xf32>
    %181 = arith.negf %180 : vector<2x128xf32>
    %182 = math.exp %181 : vector<2x128xf32>
    %cst_67 = arith.constant 1.000000e+00 : f32
    %183 = vector.broadcast %cst_67 : f32 to vector<2x128xf32>
    %184 = arith.addf %183, %182 : vector<2x128xf32>
    %185 = arith.divf %183, %184 : vector<2x128xf32>
    %186 = vector.extract_strided_slice %185 {offsets = [0, 0], sizes = [2, 32], strides = [1, 1]} : vector<2x128xf32> to vector<2x32xf32>
    %187 = vector.extract_strided_slice %185 {offsets = [0, 32], sizes = [2, 32], strides = [1, 1]} : vector<2x128xf32> to vector<2x32xf32>
    %188 = vector.extract_strided_slice %185 {offsets = [0, 96], sizes = [2, 32], strides = [1, 1]} : vector<2x128xf32> to vector<2x32xf32>
    %189 = vector.extract_strided_slice %180 {offsets = [0, 64], sizes = [2, 32], strides = [1, 1]} : vector<2x128xf32> to vector<2x32xf32>
    %190 = math.tanh %189 : vector<2x32xf32>
    %191 = arith.mulf %187, %174 : vector<2x32xf32>
    %192 = arith.mulf %186, %190 : vector<2x32xf32>
    %193 = arith.addf %191, %192 : vector<2x32xf32>
    %194 = math.tanh %193 : vector<2x32xf32>
    %195 = arith.mulf %188, %194 : vector<2x32xf32>
    %196 = vector.extract_strided_slice %138 {offsets = [6, 0], sizes = [2, 128], strides = [1, 1]} : vector<14x128xf32> to vector<2x128xf32>
    %197 = arith.truncf %195 : vector<2x32xf32> to vector<2x32xbf16>
    %cst_68 = arith.constant dense<0.000000e+00> : vector<2x128xf32>
    %198 = tpu.matmul %197, %113, %cst_68 {dimension_numbers = #tpu.dot_dimension_numbers<[1], [0], [0], [1], [0, 0, 1, 1], [], []>} : vector<2x32xbf16>, vector<32x128xbf16>, vector<2x128xf32> -> vector<2x128xf32>
    %199 = arith.addf %196, %198 : vector<2x128xf32>
    %200 = arith.negf %199 : vector<2x128xf32>
    %201 = math.exp %200 : vector<2x128xf32>
    %cst_69 = arith.constant 1.000000e+00 : f32
    %202 = vector.broadcast %cst_69 : f32 to vector<2x128xf32>
    %203 = arith.addf %202, %201 : vector<2x128xf32>
    %204 = arith.divf %202, %203 : vector<2x128xf32>
    %205 = vector.extract_strided_slice %204 {offsets = [0, 0], sizes = [2, 32], strides = [1, 1]} : vector<2x128xf32> to vector<2x32xf32>
    %206 = vector.extract_strided_slice %204 {offsets = [0, 32], sizes = [2, 32], strides = [1, 1]} : vector<2x128xf32> to vector<2x32xf32>
    %207 = vector.extract_strided_slice %204 {offsets = [0, 96], sizes = [2, 32], strides = [1, 1]} : vector<2x128xf32> to vector<2x32xf32>
    %208 = vector.extract_strided_slice %199 {offsets = [0, 64], sizes = [2, 32], strides = [1, 1]} : vector<2x128xf32> to vector<2x32xf32>
    %209 = math.tanh %208 : vector<2x32xf32>
    %210 = arith.mulf %206, %193 : vector<2x32xf32>
    %211 = arith.mulf %205, %209 : vector<2x32xf32>
    %212 = arith.addf %210, %211 : vector<2x32xf32>
    %213 = math.tanh %212 : vector<2x32xf32>
    %214 = arith.mulf %207, %213 : vector<2x32xf32>
    %215 = vector.extract_strided_slice %138 {offsets = [8, 0], sizes = [2, 128], strides = [1, 1]} : vector<14x128xf32> to vector<2x128xf32>
    %216 = arith.truncf %214 : vector<2x32xf32> to vector<2x32xbf16>
    %cst_70 = arith.constant dense<0.000000e+00> : vector<2x128xf32>
    %217 = tpu.matmul %216, %113, %cst_70 {dimension_numbers = #tpu.dot_dimension_numbers<[1], [0], [0], [1], [0, 0, 1, 1], [], []>} : vector<2x32xbf16>, vector<32x128xbf16>, vector<2x128xf32> -> vector<2x128xf32>
    %218 = arith.addf %215, %217 : vector<2x128xf32>
    %219 = arith.negf %218 : vector<2x128xf32>
    %220 = math.exp %219 : vector<2x128xf32>
    %cst_71 = arith.constant 1.000000e+00 : f32
    %221 = vector.broadcast %cst_71 : f32 to vector<2x128xf32>
    %222 = arith.addf %221, %220 : vector<2x128xf32>
    %223 = arith.divf %221, %222 : vector<2x128xf32>
    %224 = vector.extract_strided_slice %223 {offsets = [0, 0], sizes = [2, 32], strides = [1, 1]} : vector<2x128xf32> to vector<2x32xf32>
    %225 = vector.extract_strided_slice %223 {offsets = [0, 32], sizes = [2, 32], strides = [1, 1]} : vector<2x128xf32> to vector<2x32xf32>
    %226 = vector.extract_strided_slice %223 {offsets = [0, 96], sizes = [2, 32], strides = [1, 1]} : vector<2x128xf32> to vector<2x32xf32>
    %227 = vector.extract_strided_slice %218 {offsets = [0, 64], sizes = [2, 32], strides = [1, 1]} : vector<2x128xf32> to vector<2x32xf32>
    %228 = math.tanh %227 : vector<2x32xf32>
    %229 = arith.mulf %225, %212 : vector<2x32xf32>
    %230 = arith.mulf %224, %228 : vector<2x32xf32>
    %231 = arith.addf %229, %230 : vector<2x32xf32>
    %232 = math.tanh %231 : vector<2x32xf32>
    %233 = arith.mulf %226, %232 : vector<2x32xf32>
    %234 = vector.extract_strided_slice %138 {offsets = [10, 0], sizes = [2, 128], strides = [1, 1]} : vector<14x128xf32> to vector<2x128xf32>
    %235 = arith.truncf %233 : vector<2x32xf32> to vector<2x32xbf16>
    %cst_72 = arith.constant dense<0.000000e+00> : vector<2x128xf32>
    %236 = tpu.matmul %235, %113, %cst_72 {dimension_numbers = #tpu.dot_dimension_numbers<[1], [0], [0], [1], [0, 0, 1, 1], [], []>} : vector<2x32xbf16>, vector<32x128xbf16>, vector<2x128xf32> -> vector<2x128xf32>
    %237 = arith.addf %234, %236 : vector<2x128xf32>
    %238 = arith.negf %237 : vector<2x128xf32>
    %239 = math.exp %238 : vector<2x128xf32>
    %cst_73 = arith.constant 1.000000e+00 : f32
    %240 = vector.broadcast %cst_73 : f32 to vector<2x128xf32>
    %241 = arith.addf %240, %239 : vector<2x128xf32>
    %242 = arith.divf %240, %241 : vector<2x128xf32>
    %243 = vector.extract_strided_slice %242 {offsets = [0, 0], sizes = [2, 32], strides = [1, 1]} : vector<2x128xf32> to vector<2x32xf32>
    %244 = vector.extract_strided_slice %242 {offsets = [0, 32], sizes = [2, 32], strides = [1, 1]} : vector<2x128xf32> to vector<2x32xf32>
    %245 = vector.extract_strided_slice %242 {offsets = [0, 96], sizes = [2, 32], strides = [1, 1]} : vector<2x128xf32> to vector<2x32xf32>
    %246 = vector.extract_strided_slice %237 {offsets = [0, 64], sizes = [2, 32], strides = [1, 1]} : vector<2x128xf32> to vector<2x32xf32>
    %247 = math.tanh %246 : vector<2x32xf32>
    %248 = arith.mulf %244, %231 : vector<2x32xf32>
    %249 = arith.mulf %243, %247 : vector<2x32xf32>
    %250 = arith.addf %248, %249 : vector<2x32xf32>
    %251 = math.tanh %250 : vector<2x32xf32>
    %252 = arith.mulf %245, %251 : vector<2x32xf32>
    %253 = vector.extract_strided_slice %138 {offsets = [12, 0], sizes = [2, 128], strides = [1, 1]} : vector<14x128xf32> to vector<2x128xf32>
    %254 = arith.truncf %252 : vector<2x32xf32> to vector<2x32xbf16>
    %cst_74 = arith.constant dense<0.000000e+00> : vector<2x128xf32>
    %255 = tpu.matmul %254, %113, %cst_74 {dimension_numbers = #tpu.dot_dimension_numbers<[1], [0], [0], [1], [0, 0, 1, 1], [], []>} : vector<2x32xbf16>, vector<32x128xbf16>, vector<2x128xf32> -> vector<2x128xf32>
    %256 = arith.addf %253, %255 : vector<2x128xf32>
    %257 = arith.negf %256 : vector<2x128xf32>
    %258 = math.exp %257 : vector<2x128xf32>
    %cst_75 = arith.constant 1.000000e+00 : f32
    %259 = vector.broadcast %cst_75 : f32 to vector<2x128xf32>
    %260 = arith.addf %259, %258 : vector<2x128xf32>
    %261 = arith.divf %259, %260 : vector<2x128xf32>
    %262 = vector.extract_strided_slice %261 {offsets = [0, 0], sizes = [2, 32], strides = [1, 1]} : vector<2x128xf32> to vector<2x32xf32>
    %263 = vector.extract_strided_slice %261 {offsets = [0, 32], sizes = [2, 32], strides = [1, 1]} : vector<2x128xf32> to vector<2x32xf32>
    %264 = vector.extract_strided_slice %261 {offsets = [0, 96], sizes = [2, 32], strides = [1, 1]} : vector<2x128xf32> to vector<2x32xf32>
    %265 = vector.extract_strided_slice %256 {offsets = [0, 64], sizes = [2, 32], strides = [1, 1]} : vector<2x128xf32> to vector<2x32xf32>
    %266 = math.tanh %265 : vector<2x32xf32>
    %267 = arith.mulf %263, %250 : vector<2x32xf32>
    %268 = arith.mulf %262, %266 : vector<2x32xf32>
    %269 = arith.addf %267, %268 : vector<2x32xf32>
    %270 = math.tanh %269 : vector<2x32xf32>
    %271 = arith.mulf %264, %270 : vector<2x32xf32>
    %272 = tpu.concatenate %157, %176, %195, %214, %233, %252, %271 in 0 : vector<2x32xf32>, vector<2x32xf32>, vector<2x32xf32>, vector<2x32xf32>, vector<2x32xf32>, vector<2x32xf32>, vector<2x32xf32> -> vector<14x32xf32>
    %273 = arith.truncf %272 : vector<14x32xf32> to vector<14x32xbf16>
    %c0_76 = arith.constant 0 : index
    %c0_77 = arith.constant 0 : index
    %274 = vector.load %arg16[%c0_76, %c0_77] : memref<14x32xbf16, #tpu.memory_space<vmem>>, vector<14x32xbf16>
    tpu.vector_store %arg16[%c0_76, %c0_77], %273 {strides = array<i32>} : memref<14x32xbf16, #tpu.memory_space<vmem>>, vector<14x32xbf16>,
    return
  }
}

</mosaic_0001>

<bundles_post_ra>
// kernel: tpu_custom_call.1
= control target key start
LH: loop header
LB: loop body
LE: loop exit
PB: predicated region body
PF: predicated region fallthrough
CT: control target
= control target key end

     0   :  { %s3918_s0 = inlined_call_operand.vmem [shape: bf16[2,32], index: 0, kind: input, shape index: {}]   ;;  %s3919_s1 = inlined_call_operand.hbm [shape: bf16[6,32], index: 1, kind: input, shape index: {}]   ;;  %s3920_s2 = inlined_call_operand.vmem [shape: s32[2,1], index: 2, kind: input, shape index: {}]   ;;  %s3921_s3 = inlined_call_operand.vmem [shape: bf16[2,32], index: 3, kind: input, shape index: {}]   ;;  %s3922_s4 = inlined_call_operand.hbm [shape: bf16[14,32], index: 4, kind: input, shape index: {}]   ;;  %s3923_s5 = inlined_call_operand.vmem [shape: bf16[32,32], index: 5, kind: input, shape index: {}]   ;;  %s3924_s6 = inlined_call_operand.hbm [shape: f32[1,32], index: 6, kind: input, shape index: {}]   ;;  %s3925_s7 = inlined_call_operand.vmem [shape: bf16[32,64], index: 7, kind: input, shape index: {}]   ;;  %s3926_s8 = inlined_call_operand.hbm [shape: f32[1,64], index: 8, kind: input, shape index: {}]   ;;  %s3927_s9 = inlined_call_operand.vmem [shape: bf16[32,32], index: 9, kind: input, shape index: {}]   ;;  %s3928_s10 = inlined_call_operand.vmem [shape: f32[1,32], index: 10, kind: input, shape index: {}]   ;;  %s3929_s11 = inlined_call_operand.vmem [shape: bf16[96,32], index: 11, kind: input, shape index: {}]   ;;  %s3930_s12 = inlined_call_operand.vmem [shape: f32[1,32], index: 12, kind: input, shape index: {}]   ;;  %s3931_s13 = inlined_call_operand.vmem [shape: bf16[32,128], index: 13, kind: input, shape index: {}]   ;;  %s3932_s14 = inlined_call_operand.vmem [shape: bf16[32,128], index: 14, kind: input, shape index: {}]   ;;  %s3933_s15 = inlined_call_operand.vmem [shape: f32[1,128], index: 15, kind: input, shape index: {}]   ;;  %s3934_s16 = inlined_call_operand.hbm [shape: bf16[14,32], index: 16, kind: output, shape index: {}]  }
   0x1   :  { %3936 = sst [smem:[#allocation15_spill]] %s3918_s0 }
   0x2   :  { %3937 = sst [smem:[#allocation16_spill]] %s3934_s16 }
   0x3   :  { %21 = vsyncpa [#allocation3], 0 }
   0x4   :  { %22 = vsyncpa [#allocation6], 0 }
   0x5   :  { %23 = vsyncpa [#allocation9], 0 }
   0x6   :  { %24 = vsyncpa [#allocation4], 0  ;;  %s3325_s21 = smov [#allocation5]   ;;  %s3207_s25 = scalar_lea.hbm %s3922_s4, 128 }
   0x7   :  { %s46_s22 = sshll.u32 %s3325_s21, 4  ;;  %p3208_p0 = scmp.ne.s32.totalorder %s3922_s4, %s3207_s25  ;;  %s47_s22 = int_to_ptr.vmem [resolvable:$true] %s46_s22 }
   0x8   :  { %p3211_p1 = scmp.lt.u32.totalorder %s3207_s25, %s3922_s4 }
   0xa   :  { %p3213_p2 = pnand %p3211_p1, %p3208_p0 }
   0xc   :  { %3216 = shalt.err (!%p3213_p2)
}
   0xd   :  { %s3217_s30 = scalar_lea.vmem %s47_s22, 128  ;;  %p3222_p4 = scmp.lt.s32.totalorder %s47_s22, %s47_s22 }
   0xe   :  { %p3218_p3 = scmp.ne.s32.totalorder %s47_s22, %s3217_s30  ;;  %p3223_p5 = scmp.lt.s32.totalorder %s3217_s30, %s3217_s30 }
  0x10   :  { %p3224_p6 = por %p3223_p5, %p3222_p4 }
  0x12   :  { %p3225_p7 = pnand %p3224_p6, %p3218_p3 }
  0x14   :  { %3228 = shalt.err (!%p3225_p7)
}
  0x15   :  { %s3326_s0 = smov 64   ;;  %s3327_s17 = smov 4  }
  0x16   :  { %52 = dma.hbm_to_vmem [thread:$0]  %s3922_s4, 128, %s47_s22, [#allocation6], %s3326_s0, %s3326_s0, %s3327_s17  }
  0x17   :  { %s3328_s20 = smov [#allocation2]   ;;  %s3329_s23 = smov [#allocation7]  }
  0x18   :  { %s33_s21 = sshll.u32 %s3328_s20, 4  ;;  %s61_s24 = sshll.u32 %s3329_s23, 4  ;;  %s34_s21 = int_to_ptr.vmem [resolvable:$true] %s33_s21  ;;  %s62_s24 = int_to_ptr.vmem [resolvable:$true] %s61_s24 }
  0x19   :  { %s3229_s27 = scalar_lea.hbm %s3919_s1, 64 }
  0x1a   :  { %p3230_p8 = scmp.ne.s32.totalorder %s3919_s1, %s3229_s27  ;;  %p3233_p9 = scmp.lt.u32.totalorder %s3229_s27, %s3919_s1 }
  0x1c   :  { %p3235_p10 = pnand %p3233_p9, %p3230_p8 }
  0x1e   :  { %3238 = shalt.err (!%p3235_p10)
}
  0x1f   :  { %s3239_s4 = scalar_lea.vmem %s34_s21, 64  ;;  %p3244_p12 = scmp.lt.s32.totalorder %s34_s21, %s34_s21 }
  0x20   :  { %p3240_p11 = scmp.ne.s32.totalorder %s34_s21, %s3239_s4  ;;  %p3245_p13 = scmp.lt.s32.totalorder %s3239_s4, %s3239_s4 }
  0x22   :  { %p3246_p0 = por %p3245_p13, %p3244_p12 }
  0x24   :  { %p3247_p1 = pnand %p3246_p0, %p3240_p11 }
  0x26   :  { %3250 = shalt.err (!%p3247_p1)
}
  0x27   :  { %36 = dma.hbm_to_vmem [thread:$0]  %s3919_s1, 64, %s34_s21, [#allocation3]  }
  0x28   :  { %s3251_s23 = scalar_lea.hbm %s3924_s6, 16 }
  0x29   :  { %p3252_p2 = scmp.ne.s32.totalorder %s3924_s6, %s3251_s23  ;;  %p3255_p3 = scmp.lt.u32.totalorder %s3251_s23, %s3924_s6 }
  0x2b   :  { %p3257_p4 = pnand %p3255_p3, %p3252_p2 }
  0x2d   :  { %3260 = shalt.err (!%p3257_p4)
}
  0x2e   :  { %s3261_s28 = scalar_lea.vmem %s62_s24, 16  ;;  %s3265_s29 = scalar_lea.vmem %s62_s24, 32 }
  0x2f   :  { %p3262_p5 = scmp.ne.s32.totalorder %s62_s24, %s3261_s28  ;;  %p3266_p6 = scmp.lt.s32.totalorder %s62_s24, %s62_s24 }
  0x30   :  { %p3267_p7 = scmp.lt.s32.totalorder %s3265_s29, %s3261_s28 }
  0x32   :  { %p3268_p8 = por %p3267_p7, %p3266_p6 }
  0x34   :  { %p3269_p9 = pnand %p3268_p8, %p3262_p5 }
  0x36   :  { %3272 = shalt.err (!%p3269_p9)
}
  0x37   :  { %64 = dma.hbm_to_vmem [thread:$0]  %s3924_s6, 16, %s62_s24, [#allocation6]  }
  0x38   :  { %s3330_s30 = smov [#allocation8]   ;;  %s3273_s19 = scalar_lea.hbm %s3926_s8, 16 }
  0x39   :  { %s73_s4 = sshll.u32 %s3330_s30, 4  ;;  %p3274_p10 = scmp.ne.s32.totalorder %s3926_s8, %s3273_s19  ;;  %s74_s4 = int_to_ptr.vmem [resolvable:$true] %s73_s4 }
  0x3a   :  { %p3277_p11 = scmp.lt.u32.totalorder %s3273_s19, %s3926_s8 }
  0x3c   :  { %p3279_p12 = pnand %p3277_p11, %p3274_p10 }
  0x3e   :  { %3282 = shalt.err (!%p3279_p12)
}
  0x3f   :  { %s3283_s26 = scalar_lea.vmem %s74_s4, 16  ;;  %s3287_s6 = scalar_lea.vmem %s74_s4, 32 }
  0x40   :  { %p3284_p13 = scmp.ne.s32.totalorder %s74_s4, %s3283_s26  ;;  %p3288_p0 = scmp.lt.s32.totalorder %s74_s4, %s74_s4 }
  0x41   :  { %p3289_p1 = scmp.lt.s32.totalorder %s3287_s6, %s3283_s26 }
  0x43   :  { %p3290_p2 = por %p3289_p1, %p3288_p0 }
  0x45   :  { %p3291_p3 = pnand %p3290_p2, %p3284_p13 }
  0x47   :  { %3294 = shalt.err (!%p3291_p3)
}
  0x48   :  { %76 = dma.hbm_to_vmem [thread:$0]  %s3926_s8, 16, %s74_s4, [#allocation9]  }
  0x49   :  { %3317 = dma.done.wait [#allocation3], 64  }
  0x4a   :  { %3318 = vsyncadd [#allocation3], 4294967232 }
  0x4b   :  { %3319 = dma.done.wait [#allocation6], 144  }
  0x4c   :  { %3320 = vsyncadd [#allocation6], 4294967152 }
  0x4d   :  { %3321 = dma.done.wait [#allocation9], 16  }
  0x4e   :  { %3322 = vsyncadd [#allocation9], 4294967280  ;;  %v3331_v0 = vmov 0.0   ;;  %vm3332_vm0 = vmmov 0   ;;  %v3092_v1 = vld [vmem:[%s3925_s7] sm:$0xff]   ;;  %v3093_v2 = vld [vmem:[%s3925_s7 + $0x8] sm:$0xff]   ;;  %v106_v9 = vlaneseq }
  0x4f   :  { %2875 = vmatprep.subr.bf16.mxu1 %v3331_v0  ;;  %2879 = vmatprep.mubr.msk.bf16.mxu1 %vm3332_vm0, %v3331_v0  ;;  %v3094_v3 = vld [vmem:[%s3923_s5] sm:$0xff]   ;;  %vm161_vm1 = vcmask 261120   ;;  %v3095_v5 = vld [vmem:[%s3923_s5 + $0x8] sm:$0xff]   ;;  %s3938_s20 = sld [smem:[#allocation15_spill]]  ;;  %v3333_v8 = vmov 0   ;;  %vm366_vm2 = vcmask 64512  }
  0x50   :  { %2867 = vmatprep.subr.bf16.mxu0 %v3331_v0  ;;  %2871 = vmatprep.mubr.msk.bf16.mxu0 %vm3332_vm0, %v3331_v0  ;;  %v205_v4 = vld [vmem:[#allocation2] sm:$0x7]  ;;  %v3334_v10 = vmov 1966171168   ;;  %v3520_v13 = vshrl.u32 %v106_v9, 7  ;;  %v107_v54 = vand.u32 127, %v106_v9 }
  0x51   :  { %2876 = vmatpush3.bf16.msra.mxu1 %v3092_v1  ;;  %2868 = vmatpush3.bf16.msra.mxu0 %v3094_v3  ;;  %v108_v7 = vld [vmem:[%s3920_s2] sm:$0x3]  ;;  %v115_v11 = vunpack.c.l.s4 %v3334_v10  ;;  %v2716_v14 = vld [vmem:[#allocation8] ss:$0 sm:$0xff]  ;;  %v2712_v19 = vld [vmem:[#allocation7] ss:$0 sm:$0xff] }
  0x52   :  { %2877 = vmatprep.subr.bf16.mxu1 %v3331_v0  ;;  %2869 = vmatprep.subr.bf16.mxu0 %v3331_v0  ;;  %v723_v33 = vsub.s32 0, %v3520_v13  ;;  %vm542_vm5 = vcmask 16384   ;;  %s3335_s2 = smov 96   ;;  %s3336_s23 = smov 120   ;;  %vm571_vm7 = vcmask 1042432   ;;  %vm567_vm8 = vcmask 23552  }
  0x53   :  { %3081 = vset.pattern.permute.xlu0 %v3333_v8  ;;  %v116_v12 = vunpack.c.0.s8 %v115_v11  ;;  %s3337_s16 = smov 88   ;;  %s3338_s25 = smov 112   ;;  %vm1763_vm9 = vcmask 130048   ;;  %vm1766_vm10 = vcmask 195584   ;;  %vm1787_vm11 = vcmask 1041409  }
  0x54   :  { %110 = vperm.xlu0 %3081, %v108_v7   ;;  %s3339_s26 = smov 80   ;;  %s3340_s6 = smov 104   ;;  %vm1868_vm12 = vcmask 523264   ;;  %vm1926_vm13 = vcmask 785408   ;;  %vm2669_vm14 = vcmask 1041408   ;;  %vm2671_vm15 = vcmask 1043456  }
  0x55   :  { %2878 = vmatpush3.bf16.msra.mxu1 %v3093_v2  ;;  %v3506_v6 = vld [vmem:[%s3938_s20] sm:$0x1]  ;;  %2870 = vmatpush3.bf16.msra.mxu0 %v3095_v5  ;;  %v3523_v15 = vsub.s32 %v116_v12, %v3520_v13  ;;  %s3341_s24 = smov 72   ;;  %s3342_s27 = smov 8  }
  0x56   :  { %2883 = vmatprep.subr.mxu1 %v3331_v0  ;;  %2893 = vmatprep.subr.mxu0 %v3331_v0  ;;  %s3343_s28 = smov 16   ;;  %s3344_s30 = smov 24  }
  0x58   :  { %2880 = vmatmul.mubr.msk.bf16.vlgmr.msra.gmra.mrb[0].mxu1 %vm161_vm1, %v205_v4  ;;  %2872 = vmatmul.mubr.msk.bf16.vlgmr.msra.gmra.mrb[0].mxu0 %vm161_vm1, %v3506_v6 }
  0x59   :  { %2885 = vmatprep.mubr.msk.f32.mxu1 %vm3332_vm0, %v3331_v0  ;;  %2895 = vmatprep.mubr.msk.f32.mxu0 %vm3332_vm0, %v3331_v0 }
  0xd3   :  { %v111_v55 = vpop.permute.xlu0 %110 }
  0xd4   :  { %vm112_vm3 = vcmp.ge.s32.totalorder %v107_v54, %v111_v55 }
  0xd5   :  { %v113_v56 = vsel %vm112_vm3, 1, %v3333_v8 }
  0xd6   :  { %v120_v57 = vrot.slane %v113_v56, %v3523_v15 }
  0xd8   :  { %v128_v58 = vrot.slane %v120_v57, %v3523_v15  ;;  %v121_v59 = vcombine.high %v120_v57, %v120_v57 }
  0xda   :  { %vm3561_vm4 = vcmp.ne.s32.totalorder %v128_v58, 0  ;;  %v3566_v1 = vrot.slane %v121_v59, %v3523_v15 }
  0xdc   :  { %vm137_vm6 = vcmp.ne.s32.totalorder %v3566_v1, 0 }
 0x12b   :  { %v266_v16 = vpop.f32.mrb[0].mxu1  ;;  %v199_v24 = vpop.f32.mrb[0].mxu0 }
 0x12c   :  { %v267_v17 = vadd.f32 %v2716_v14, %v266_v16  ;;  %v2881_v18 = vpop.f32.mrb[1].mxu1  ;;  %v200_v25 = vadd.f32 %v2712_v19, %v199_v24  ;;  %v2873_v26 = vpop.f32.mrb[1].mxu0 }
 0x12d   :  { %v269_v20 = vpop.f32.mrb[2].mxu1  ;;  %v202_v30 = vpop.f32.mrb[2].mxu0 }
 0x12e   :  { %v273_v21 = vcombine.high %v267_v17, %v267_v17  ;;  %v280_v22 = vrot.slane %v267_v17, %v3523_v15  ;;  %v2882_v23 = vpop.f32.mrb[3].mxu1  ;;  %v327_v31 = vrot.slane %v200_v25, %v3523_v15  ;;  %v2874_v32 = vpop.f32.mrb[3].mxu0 }
 0x130   :  { %v287_v27 = vrot.slane %v273_v21, %v3523_v15  ;;  %v288_v28 = vcombine.high %v280_v22, %v280_v22  ;;  %v296_v29 = vrot.slane %v280_v22, %v3523_v15  ;;  %v335_v37 = vrot.slane %v327_v31, %v3523_v15 }
 0x131   :  { %v328_v51 = vcombine.high %v327_v31, %v327_v31 }
 0x132   :  { %v289_v34 = vcombine.high %v287_v27, %v287_v27  ;;  %v310_v35 = vrot.slane %v288_v28, %v3523_v15  ;;  %v318_v36 = vcombine.high %v296_v29, %v296_v29  ;;  %v303_v38 = vrot.slane %v287_v27, %v3523_v15 }
 0x133   :  { %v3534_v42 = vrot.slane %v335_v37, %v723_v33  ;;  %v342_v53 = vrot.slane %v328_v51, %v3523_v15 }
 0x134   :  { %v317_v39 = vrot.slane %v289_v34, %v3523_v15  ;;  %v319_v40 = vcombine.high %v310_v35, %v310_v35  ;;  %v343_v41 = vcombine.low %v296_v29, %v310_v35  ;;  %v357_v44 = vrot.slane %v318_v36, %v3523_v15 }
 0x135   :  { %v3579_v10 = vrot.slane %v342_v53, %v723_v33 }
 0x136   :  { %v350_v43 = vrot.slane %v343_v41, %v3523_v15  ;;  %v441_v45 = vcombine.low %v319_v40, %v303_v38  ;;  %v455_v48 = vrot.slane %v317_v39, %v3523_v15 }
 0x138   :  { %v358_v46 = vcombine.low %v350_v43, %v357_v44  ;;  %v448_v47 = vrot.slane %v441_v45, %v3523_v15 }
 0x13a   :  { %v3541_v49 = vrot.slane %v358_v46, %v3523_v15  ;;  %v456_v50 = vcombine.low %v448_v47, %v455_v48 }
 0x13c   :  { %2884 = vmatpush3.xpose.msk.msra.mxu1 %vm366_vm2, %v3541_v49  ;;  %v3547_v52 = vrot.slane %v456_v50, %v3523_v15 }
 0x13d   :  { %2888 = vmatprep.subr.mxu1 %v3331_v0 }
 0x13f   :  { %2886 = vmatmul.mubr.msk.f32.vlgmr.msra.gmra.mrb[4].mxu1 %vm366_vm2, %v335_v37 }
 0x140   :  { %2889 = vmatpush3.xpose.msk.msra.mxu1 %vm366_vm2, %v3547_v52  ;;  %2890 = vmatprep.mubr.msk.f32.mxu1 %vm3332_vm0, %v3331_v0 }
 0x141   :  { %2898 = vmatprep.subr.mxu1 %v3331_v0 }
 0x143   :  { %2891 = vmatmul.mubr.msk.f32.vlgmr.msra.gmra.mrb[6].mxu1 %vm366_vm2, %v342_v53 }
 0x144   :  { %2900 = vmatprep.mubr.msk.f32.mxu1 %vm3332_vm0, %v3331_v0 }
 0x212   :  { %v437_v60 = vpop.f32.mrb[4].mxu1 }
 0x213   :  { %v538_v62 = vmul.f32 0.35355338, %v437_v60  ;;  %v2887_v63 = vpop.f32.mrb[5].mxu1 }
 0x215   :  { %v540_v2 = vsel %vm3561_vm4, -1e+30, %v538_v62 }
 0x216   :  { %v534_v3 = vpop.f32.mrb[6].mxu1  ;;  %v543_v4 = vsel %vm542_vm5, %v540_v2, -inf }
 0x217   :  { %v539_v5 = vmul.f32 0.35355338, %v534_v3  ;;  %544 = vmax.xlane.f32.xlu1 %v543_v4  ;;  %v2892_v7 = vpop.f32.mrb[7].mxu1 }
 0x219   :  { %v541_v8 = vsel %vm137_vm6, -1e+30, %v539_v5 }
 0x21a   :  { %v546_v9 = vsel %vm542_vm5, %v541_v8, -inf }
 0x21b   :  { %547 = vmax.xlane.f32.xlu0 %v546_v9 }
 0x228   :  { %644 = vrot.lane.b32.xlu1 %v3547_v52, %s3335_s2 }
 0x22c   :  { %565 = vrot.lane.b32.xlu1 %v3541_v49, %s3335_s2 }
 0x230   :  { %809 = vrot.lane.b32.xlu1 %v3547_v52, %s3336_s23 }
 0x231   :  { %727 = vrot.lane.b32.xlu0 %v3541_v49, %s3336_s23 }
 0x234   :  { %807 = vrot.lane.b32.xlu1 %v3579_v10, %s3336_s23 }
 0x2a4   :  { %v545_v11 = vpop.xlane.xlu1 %544 }
 0x2a5   :  { %v549_v12 = vsub.f32 %v540_v2, %v545_v11 }
 0x2a7   :  { %v551_v13 = vmul.f32 1.442695, %v549_v12 }
 0x2a8   :  { %v645_v14 = vpop.permute.xlu1 %644  ;;  %v548_v16 = vpop.xlane.xlu0 %547 }
 0x2a9   :  { %3109 = vpow2.f32 %v551_v13  ;;  %v550_v17 = vsub.f32 %v541_v8, %v548_v16  ;;  %2899 = vmatpush3.msk.msra.mxu1 %vm571_vm7, %v645_v14 }
 0x2aa   :  { %2908 = vmatprep.subr.mxu1 %v3331_v0 }
 0x2ab   :  { %v553_v18 = vmul.f32 1.442695, %v550_v17 }
 0x2ac   :  { %v566_v19 = vpop.permute.xlu1 %565  ;;  %v728_v30 = vpop.permute.xlu0 %727 }
 0x2ad   :  { %3111 = vpow2.f32 %v553_v18  ;;  %2894 = vmatpush3.msk.msra.mxu0 %vm571_vm7, %v566_v19 }
 0x2ae   :  { %2903 = vmatprep.subr.mxu0 %v3331_v0 }
 0x2b0   :  { %v810_v24 = vpop.permute.xlu1 %809 }
 0x2b3   :  { %v3110_v20 = vpop.eup %3109 }
 0x2b4   :  { %v555_v21 = vsel %vm542_vm5, %v3110_v20, 0.0  ;;  %v808_v25 = vpop.permute.xlu1 %807 }
 0x2b5   :  { %556 = vadd.xlane.f32.xlu1 %v555_v21 }
 0x2b7   :  { %v3112_v22 = vpop.eup %3111 }
 0x2b8   :  { %v558_v23 = vsel %vm542_vm5, %v3112_v22, 0.0 }
 0x2b9   :  { %559 = vadd.xlane.f32.xlu1 %v558_v23 }
 0x2ca   :  { %725 = vrot.lane.b32.xlu1 %v3534_v42, %s3336_s23 }
 0x342   :  { %v557_v26 = vpop.xlane.xlu1 %556 }
 0x343   :  { %3113 = vrcp.f32 %v557_v26 }
 0x346   :  { %v560_v27 = vpop.xlane.xlu1 %559 }
 0x347   :  { %3115 = vrcp.f32 %v560_v27 }
 0x34a   :  { %v726_v33 = vpop.permute.xlu1 %725 }
 0x34d   :  { %v3114_v28 = vpop.eup %3113 }
 0x34e   :  { %v563_v29 = vmul.f32 %v3114_v28, %v3110_v20 }
 0x350   :  { %2896 = vmatmul.mubr.msk.f32.vlgmr.msra.gmra.mrb[4].mxu0 %vm567_vm8, %v563_v29 }
 0x351   :  { %v3116_v31 = vpop.eup %3115  ;;  %2904 = vmatpush3.xpose.msk.msra.mxu0 %vm366_vm2, %v728_v30  ;;  %2905 = vmatprep.mubr.msk.f32.mxu0 %vm3332_vm0, %v3331_v0 }
 0x352   :  { %v564_v32 = vmul.f32 %v3116_v31, %v3112_v22  ;;  %2913 = vmatprep.subr.mxu0 %v3331_v0 }
 0x354   :  { %2901 = vmatmul.mubr.msk.f32.vlgmr.msra.gmra.mrb[8].mxu1 %vm567_vm8, %v564_v32  ;;  %2906 = vmatmul.mubr.msk.f32.vlgmr.msra.gmra.mrb[6].mxu0 %vm366_vm2, %v726_v33 }
 0x355   :  { %2909 = vmatpush3.xpose.msk.msra.mxu1 %vm366_vm2, %v810_v24  ;;  %2910 = vmatprep.mubr.msk.f32.mxu1 %vm3332_vm0, %v3331_v0 }
 0x356   :  { %2918 = vmatprep.subr.mxu1 %v3331_v0  ;;  %2915 = vmatprep.mubr.msk.f32.mxu0 %vm3332_vm0, %v3331_v0 }
 0x358   :  { %2911 = vmatmul.mubr.msk.f32.vlgmr.msra.gmra.mrb[10].mxu1 %vm366_vm2, %v808_v25 }
 0x359   :  { %2920 = vmatprep.mubr.msk.f32.mxu1 %vm3332_vm0, %v3331_v0 }
 0x423   :  { %v3605_v34 = vpop.f32.mrb[4].mxu0 }
 0x424   :  { %v2897_v35 = vpop.f32.mrb[5].mxu0 }
 0x427   :  { %v3607_v36 = vpop.f32.mrb[8].mxu1  ;;  %v799_v37 = vpop.f32.mrb[6].mxu0 }
 0x428   :  { %v885_v38 = vmul.f32 0.35355338, %v799_v37  ;;  %v2902_v39 = vpop.f32.mrb[9].mxu1  ;;  %v2907_v40 = vpop.f32.mrb[7].mxu0 }
 0x42a   :  { %v887_v41 = vsel %vm3561_vm4, -1e+30, %v885_v38 }
 0x42b   :  { %v881_v43 = vpop.f32.mrb[10].mxu1  ;;  %v889_v44 = vsel %vm542_vm5, %v887_v41, -inf }
 0x42c   :  { %v886_v45 = vmul.f32 0.35355338, %v881_v43  ;;  %v2912_v46 = vpop.f32.mrb[11].mxu1  ;;  %890 = vmax.xlane.f32.xlu0 %v889_v44 }
 0x42e   :  { %v888_v47 = vsel %vm137_vm6, -1e+30, %v886_v45 }
 0x42f   :  { %v892_v48 = vsel %vm542_vm5, %v888_v47, -inf }
 0x430   :  { %893 = vmax.xlane.f32.xlu1 %v892_v48 }
 0x441   :  { %911 = vrot.lane.b32.xlu1 %v3541_v49, %s3337_s16 }
 0x442   :  { %988 = vrot.lane.b32.xlu0 %v3547_v52, %s3337_s16 }
 0x445   :  { %1145 = vrot.lane.b32.xlu1 %v3547_v52, %s3338_s25 }
 0x446   :  { %1067 = vrot.lane.b32.xlu0 %v3541_v49, %s3338_s25 }
 0x44a   :  { %1065 = vrot.lane.b32.xlu0 %v3534_v42, %s3338_s25 }
 0x4b9   :  { %v891_v50 = vpop.xlane.xlu0 %890 }
 0x4ba   :  { %v895_v51 = vsub.f32 %v887_v41, %v891_v50 }
 0x4bc   :  { %v897_v53 = vmul.f32 1.442695, %v895_v51 }
 0x4bd   :  { %v894_v54 = vpop.xlane.xlu1 %893  ;;  %v989_v55 = vpop.permute.xlu0 %988 }
 0x4be   :  { %3117 = vpow2.f32 %v897_v53  ;;  %v896_v56 = vsub.f32 %v888_v47, %v894_v54  ;;  %2919 = vmatpush3.msk.msra.mxu1 %vm571_vm7, %v989_v55 }
 0x4bf   :  { %2928 = vmatprep.subr.mxu1 %v3331_v0 }
 0x4c0   :  { %v899_v57 = vmul.f32 1.442695, %v896_v56 }
 0x4c1   :  { %v912_v58 = vpop.permute.xlu1 %911  ;;  %v1068_v7 = vpop.permute.xlu0 %1067 }
 0x4c2   :  { %3119 = vpow2.f32 %v899_v57  ;;  %2914 = vmatpush3.msk.msra.mxu0 %vm571_vm7, %v912_v58 }
 0x4c3   :  { %2923 = vmatprep.subr.mxu0 %v3331_v0 }
 0x4c5   :  { %v1146_v2 = vpop.permute.xlu1 %1145  ;;  %v1066_v12 = vpop.permute.xlu0 %1065 }
 0x4c8   :  { %v3118_v59 = vpop.eup %3117 }
 0x4c9   :  { %v901_v60 = vsel %vm542_vm5, %v3118_v59, 0.0 }
 0x4ca   :  { %902 = vadd.xlane.f32.xlu1 %v901_v60 }
 0x4cc   :  { %v3120_v62 = vpop.eup %3119 }
 0x4cd   :  { %v904_v63 = vsel %vm542_vm5, %v3120_v62, 0.0 }
 0x4ce   :  { %905 = vadd.xlane.f32.xlu1 %v904_v63 }
 0x4df   :  { %1143 = vrot.lane.b32.xlu1 %v3579_v10, %s3338_s25 }
 0x557   :  { %v903_v3 = vpop.xlane.xlu1 %902 }
 0x558   :  { %3121 = vrcp.f32 %v903_v3 }
 0x55b   :  { %v906_v4 = vpop.xlane.xlu1 %905 }
 0x55c   :  { %3123 = vrcp.f32 %v906_v4 }
 0x55f   :  { %v1144_v13 = vpop.permute.xlu1 %1143 }
 0x562   :  { %v3122_v5 = vpop.eup %3121 }
 0x563   :  { %v909_v8 = vmul.f32 %v3122_v5, %v3118_v59 }
 0x565   :  { %2916 = vmatmul.mubr.msk.f32.vlgmr.msra.gmra.mrb[8].mxu0 %vm567_vm8, %v909_v8 }
 0x566   :  { %v3124_v9 = vpop.eup %3123  ;;  %2924 = vmatpush3.xpose.msk.msra.mxu0 %vm366_vm2, %v1068_v7  ;;  %2925 = vmatprep.mubr.msk.f32.mxu0 %vm3332_vm0, %v3331_v0 }
 0x567   :  { %v910_v11 = vmul.f32 %v3124_v9, %v3120_v62  ;;  %2933 = vmatprep.subr.mxu0 %v3331_v0 }
 0x569   :  { %2921 = vmatmul.mubr.msk.f32.vlgmr.msra.gmra.mrb[12].mxu1 %vm567_vm8, %v910_v11  ;;  %2926 = vmatmul.mubr.msk.f32.vlgmr.msra.gmra.mrb[10].mxu0 %vm366_vm2, %v1066_v12 }
 0x56a   :  { %2929 = vmatpush3.xpose.msk.msra.mxu1 %vm366_vm2, %v1146_v2  ;;  %2930 = vmatprep.mubr.msk.f32.mxu1 %vm3332_vm0, %v3331_v0 }
 0x56b   :  { %2938 = vmatprep.subr.mxu1 %v3331_v0  ;;  %2935 = vmatprep.mubr.msk.f32.mxu0 %vm3332_vm0, %v3331_v0 }
 0x56d   :  { %2931 = vmatmul.mubr.msk.f32.vlgmr.msra.gmra.mrb[14].mxu1 %vm366_vm2, %v1144_v13 }
 0x56e   :  { %2940 = vmatprep.mubr.msk.f32.mxu1 %vm3332_vm0, %v3331_v0 }
 0x638   :  { %v3643_v14 = vpop.f32.mrb[8].mxu0 }
 0x639   :  { %v2917_v16 = vpop.f32.mrb[9].mxu0 }
 0x63c   :  { %v3645_v17 = vpop.f32.mrb[12].mxu1  ;;  %v1139_v18 = vpop.f32.mrb[10].mxu0 }
 0x63d   :  { %v3082_v19 = vpack.i.bf16 %v3643_v14, %v3645_v17  ;;  %v1221_v20 = vmul.f32 0.35355338, %v1139_v18  ;;  %v2922_v21 = vpop.f32.mrb[13].mxu1  ;;  %v2927_v22 = vpop.f32.mrb[11].mxu0 }
 0x63f   :  { %v1223_v23 = vsel %vm3561_vm4, -1e+30, %v1221_v20 }
 0x640   :  { %v1217_v24 = vpop.f32.mrb[14].mxu1  ;;  %v1225_v25 = vsel %vm542_vm5, %v1223_v23, -inf }
 0x641   :  { %v1222_v26 = vmul.f32 0.35355338, %v1217_v24  ;;  %v2932_v27 = vpop.f32.mrb[15].mxu1  ;;  %1226 = vmax.xlane.f32.xlu0 %v1225_v25 }
 0x642   :  { %v3097_v27 = vld [vmem:[%s3927_s9 + $0x8] sm:$0xff]  }
 0x643   :  { %v1224_v28 = vsel %vm137_vm6, -1e+30, %v1222_v26 }
 0x644   :  { %v1228_v29 = vsel %vm542_vm5, %v1224_v28, -inf }
 0x645   :  { %1229 = vmax.xlane.f32.xlu1 %v1228_v29 }
 0x656   :  { %1247 = vrot.lane.b32.xlu1 %v3541_v49, %s3339_s26 }
 0x657   :  { %1324 = vrot.lane.b32.xlu0 %v3547_v52, %s3339_s26 }
 0x65a   :  { %1481 = vrot.lane.b32.xlu1 %v3547_v52, %s3340_s6 }
 0x6ce   :  { %v1227_v30 = vpop.xlane.xlu0 %1226 }
 0x6cf   :  { %v1231_v31 = vsub.f32 %v1223_v23, %v1227_v30 }
 0x6d1   :  { %v1233_v32 = vmul.f32 1.442695, %v1231_v31 }
 0x6d2   :  { %v1230_v33 = vpop.xlane.xlu1 %1229  ;;  %v1325_v35 = vpop.permute.xlu0 %1324 }
 0x6d3   :  { %3125 = vpow2.f32 %v1233_v32  ;;  %v1232_v37 = vsub.f32 %v1224_v28, %v1230_v33  ;;  %2939 = vmatpush3.msk.msra.mxu1 %vm571_vm7, %v1325_v35 }
 0x6d4   :  { %2948 = vmatprep.subr.mxu1 %v3331_v0 }
 0x6d5   :  { %v1235_v38 = vmul.f32 1.442695, %v1232_v37 }
 0x6d6   :  { %v1248_v39 = vpop.permute.xlu1 %1247 }
 0x6d7   :  { %3127 = vpow2.f32 %v1235_v38  ;;  %2934 = vmatpush3.msk.msra.mxu0 %vm571_vm7, %v1248_v39 }
 0x6d8   :  { %2943 = vmatprep.subr.mxu0 %v3331_v0 }
 0x6da   :  { %v1482_v45 = vpop.permute.xlu1 %1481 }
 0x6dd   :  { %v3126_v40 = vpop.eup %3125 }
 0x6de   :  { %v1237_v41 = vsel %vm542_vm5, %v3126_v40, 0.0 }
 0x6df   :  { %1238 = vadd.xlane.f32.xlu1 %v1237_v41 }
 0x6e1   :  { %v3128_v43 = vpop.eup %3127 }
 0x6e2   :  { %v1240_v44 = vsel %vm542_vm5, %v3128_v43, 0.0 }
 0x6e3   :  { %1241 = vadd.xlane.f32.xlu0 %v1240_v44 }
 0x6f0   :  { %1479 = vrot.lane.b32.xlu1 %v3579_v10, %s3340_s6 }
 0x6f9   :  { %1403 = vrot.lane.b32.xlu0 %v3541_v49, %s3340_s6 }
 0x6fd   :  { %1401 = vrot.lane.b32.xlu0 %v3534_v42, %s3340_s6 }
 0x76c   :  { %v1239_v46 = vpop.xlane.xlu1 %1238 }
 0x76d   :  { %3129 = vrcp.f32 %v1239_v46 }
 0x770   :  { %v1242_v47 = vpop.xlane.xlu0 %1241  ;;  %v1480_v54 = vpop.permute.xlu1 %1479 }
 0x771   :  { %3131 = vrcp.f32 %v1242_v47 }
 0x774   :  { %v1404_v50 = vpop.permute.xlu0 %1403 }
 0x777   :  { %v3130_v48 = vpop.eup %3129 }
 0x778   :  { %v1245_v51 = vmul.f32 %v3130_v48, %v3126_v40  ;;  %v1402_v42 = vpop.permute.xlu0 %1401 }
 0x77a   :  { %2936 = vmatmul.mubr.msk.f32.vlgmr.msra.gmra.mrb[12].mxu0 %vm567_vm8, %v1245_v51 }
 0x77b   :  { %v3132_v53 = vpop.eup %3131  ;;  %2944 = vmatpush3.xpose.msk.msra.mxu0 %vm366_vm2, %v1404_v50  ;;  %2945 = vmatprep.mubr.msk.f32.mxu0 %vm3332_vm0, %v3331_v0 }
 0x77c   :  { %v1246_v10 = vmul.f32 %v3132_v53, %v3128_v43  ;;  %2953 = vmatprep.subr.mxu0 %v3331_v0 }
 0x77e   :  { %2941 = vmatmul.mubr.msk.f32.vlgmr.msra.gmra.mrb[16].mxu1 %vm567_vm8, %v1246_v10  ;;  %2946 = vmatmul.mubr.msk.f32.vlgmr.msra.gmra.mrb[14].mxu0 %vm366_vm2, %v1402_v42 }
 0x77f   :  { %2949 = vmatpush3.xpose.msk.msra.mxu1 %vm366_vm2, %v1482_v45  ;;  %2950 = vmatprep.mubr.msk.f32.mxu1 %vm3332_vm0, %v3331_v0 }
 0x780   :  { %2958 = vmatprep.subr.mxu1 %v3331_v0  ;;  %2955 = vmatprep.mubr.msk.f32.mxu0 %vm3332_vm0, %v3331_v0 }
 0x782   :  { %2951 = vmatmul.mubr.msk.f32.vlgmr.msra.gmra.mrb[18].mxu1 %vm366_vm2, %v1480_v54 }
 0x783   :  { %2960 = vmatprep.mubr.msk.f32.mxu1 %vm3332_vm0, %v3331_v0 }
 0x84d   :  { %v1320_v55 = vpop.f32.mrb[12].mxu0 }
 0x84e   :  { %v2937_v56 = vpop.f32.mrb[13].mxu0 }
 0x84f   :  { %v3098_v56 = vld [vmem:[%s3929_s11] sm:$0xff]  }
 0x851   :  { %v1397_v57 = vpop.f32.mrb[16].mxu1  ;;  %v1475_v58 = vpop.f32.mrb[14].mxu0 }
 0x852   :  { %v3087_v59 = vpack.i.bf16 %v1320_v55, %v1397_v57  ;;  %v1557_v60 = vmul.f32 0.35355338, %v1475_v58  ;;  %v2942_v62 = vpop.f32.mrb[17].mxu1  ;;  %v2947_v63 = vpop.f32.mrb[15].mxu0  ;;  %v3099_v57 = vld [vmem:[%s3929_s11 + $0x8] sm:$0xff]   ;;  %v3100_v58 = vld [vmem:[%s3929_s11 + $0x10] sm:$0xff]  }
 0x853   :  { %v2752_v62 = vld [vmem:[%s3928_s10] ss:$0 sm:$0xff] }
 0x854   :  { %v1559_v2 = vsel %vm3561_vm4, -1e+30, %v1557_v60  ;;  %v3103_v60 = vld [vmem:[%s3929_s11 + $0x28] sm:$0xff]  }
 0x855   :  { %v1553_v3 = vpop.f32.mrb[18].mxu1  ;;  %v1561_v4 = vsel %vm542_vm5, %v1559_v2, -inf }
 0x856   :  { %v1558_v5 = vmul.f32 0.35355338, %v1553_v3  ;;  %v2952_v7 = vpop.f32.mrb[19].mxu1  ;;  %1562 = vmax.xlane.f32.xlu0 %v1561_v4 }
 0x858   :  { %v1560_v8 = vsel %vm137_vm6, -1e+30, %v1558_v5 }
 0x859   :  { %v1564_v9 = vsel %vm542_vm5, %v1560_v8, -inf }
 0x85a   :  { %1565 = vmax.xlane.f32.xlu1 %v1564_v9 }
 0x8e3   :  { %v1563_v11 = vpop.xlane.xlu0 %1562 }
 0x8e4   :  { %v1567_v12 = vsub.f32 %v1559_v2, %v1563_v11 }
 0x8e6   :  { %v1569_v13 = vmul.f32 1.442695, %v1567_v12 }
 0x8e7   :  { %v1566_v16 = vpop.xlane.xlu1 %1565 }
 0x8e8   :  { %3133 = vpow2.f32 %v1569_v13  ;;  %v1568_v18 = vsub.f32 %v1560_v8, %v1566_v16  ;;  %v3104_v13 = vld [vmem:[%s3931_s13] sm:$0xff]   ;;  %v3105_v16 = vld [vmem:[%s3931_s13 + $0x8] sm:$0xff]  }
 0x8ea   :  { %v1571_v61 = vmul.f32 1.442695, %v1568_v18 }
 0x8ec   :  { %3135 = vpow2.f32 %v1571_v61 }
 0x8f2   :  { %v3134_v20 = vpop.eup %3133 }
 0x8f3   :  { %v1573_v21 = vsel %vm542_vm5, %v3134_v20, 0.0 }
 0x8f4   :  { %1574 = vadd.xlane.f32.xlu1 %v1573_v21 }
 0x8f6   :  { %v3136_v22 = vpop.eup %3135 }
 0x8f7   :  { %v1576_v23 = vsel %vm542_vm5, %v3136_v22, 0.0 }
 0x8f8   :  { %1577 = vadd.xlane.f32.xlu0 %v1576_v23 }
 0x905   :  { %1583 = vrot.lane.b32.xlu1 %v3541_v49, %s3341_s24 }
 0x909   :  { %3083 = vrot.lane.b32.xlu1 %v3082_v19, %s3342_s27  ;;  %v3096_v19 = vld [vmem:[%s3927_s9] sm:$0xff]   ;;  %s3345_s27 = smov 32  }
 0x90e   :  { %1660 = vrot.lane.b32.xlu0 %v3547_v52, %s3341_s24 }
 0x912   :  { %3088 = vrot.lane.b32.xlu0 %v3087_v59, %s3343_s28  ;;  %v3102_v59 = vld [vmem:[%s3929_s11 + $0x20] sm:$0xff]  }
 0x981   :  { %v1575_v1 = vpop.xlane.xlu1 %1574 }
 0x982   :  { %3137 = vrcp.f32 %v1575_v1 }
 0x985   :  { %v1584_v24 = vpop.permute.xlu1 %1583  ;;  %v1578_v25 = vpop.xlane.xlu0 %1577 }
 0x986   :  { %3139 = vrcp.f32 %v1578_v25  ;;  %2954 = vmatpush3.msk.msra.mxu0 %vm571_vm7, %v1584_v24  ;;  %v3777_v24 = vld [vmem:[%s3933_s15] ss:$0 sm:$0xff] }
 0x987   :  { %2963 = vmatprep.subr.bf16.mxu0 %v3331_v0 }
 0x989   :  { %v1661_v26 = vpop.permute.xlu0 %1660  ;;  %v3084_v32 = vpop.permute.xlu1 %3083 }
 0x98a   :  { %2959 = vmatpush3.msk.msra.mxu1 %vm571_vm7, %v1661_v26  ;;  %v3086_v35 = vunpack.i.h.bf16 %v3084_v32  ;;  %v3085_v38 = vunpack.i.l.bf16 %v3084_v32 }
 0x98b   :  { %2971 = vmatprep.subr.bf16.mxu1 %v3331_v0 }
 0x98c   :  { %v3138_v49 = vpop.eup %3137  ;;  %v1761_v41 = vsel %vm366_vm2, %v3605_v34, %v3086_v35  ;;  %v1762_v45 = vsel %vm366_vm2, %v3607_v36, %v3085_v38  ;;  %v2756_v34 = vld.sshfl [vmem:[%s3921_s3] sm:$0x1 pattern:$0x75316420]  ;;  %vm2673_vm2 = vcmask 1045504  }
 0x98d   :  { %v1581_v14 = vmul.f32 %v3138_v49, %v3134_v20  ;;  %v3089_v33 = vpop.permute.xlu0 %3088  ;;  %v1863_v36 = vrot.slane %v2756_v34, %v3523_v15  ;;  %v3101_v15 = vld [vmem:[%s3929_s11 + $0x18] sm:$0xff]   ;;  %v3785_v38 = vld [vmem:[%s3932_s14] sm:$0xff]  }
 0x98e   :  { %v3091_v37 = vunpack.i.h.bf16 %v3089_v33  ;;  %v3090_v39 = vunpack.i.l.bf16 %v3089_v33 }
 0x98f   :  { %2956 = vmatmul.mubr.msk.f32.vlgmr.msra.gmra.mrb[16].mxu0 %vm567_vm8, %v1581_v14 }
 0x990   :  { %v3140_v52 = vpop.eup %3139  ;;  %2967 = vmatprep.mubr.msk.bf16.mxu0 %vm3332_vm0, %v3331_v0  ;;  %2964 = vmatpush3.bf16.msra.mxu0 %v3096_v19  ;;  %v1764_v43 = vsel %vm1763_vm9, %v1761_v41, %v3091_v37  ;;  %v1765_v47 = vsel %vm1763_vm9, %v1762_v45, %v3090_v39  ;;  %v3106_v37 = vld [vmem:[#allocation5] sm:$0x7f]  }
 0x991   :  { %v1582_v17 = vmul.f32 %v3140_v52, %v3136_v22  ;;  %2965 = vmatprep.subr.bf16.mxu0 %v3331_v0  ;;  %v3793_v39 = vld [vmem:[%s3932_s14 + $0x8] sm:$0xff]   ;;  %s3346_s14 = smov [#allocation10]  }
 0x992   :  { %s2698_s4 = sshll.u32 %s3346_s14, 4  ;;  %s2699_s4 = int_to_ptr.vmem [resolvable:$true] %s2698_s4 }
 0x993   :  { %2961 = vmatmul.mubr.msk.f32.vlgmr.msra.gmra.mrb[20].mxu1 %vm567_vm8, %v1582_v17  ;;  %s3295_s22 = scalar_lea.vmem %s2699_s4, 128  ;;  %p3300_p5 = scmp.lt.s32.totalorder %s2699_s4, %s2699_s4 }
 0x994   :  { %2983 = vmatprep.mubr.msk.bf16.mxu1 %vm3332_vm0, %v3331_v0  ;;  %2966 = vmatpush3.bf16.msra.mxu0 %v3097_v27  ;;  %p3296_p4 = scmp.ne.s32.totalorder %s2699_s4, %s3295_s22  ;;  %p3301_p6 = scmp.lt.s32.totalorder %s3295_s22, %s3295_s22 }
 0x995   :  { %2987 = vmatprep.subr.bf16.mxu0 %v3331_v0  ;;  %2972 = vmatpush3.bf16.msra.mxu1 %v3098_v56 }
 0x996   :  { %2973 = vmatprep.subr.bf16.mxu1 %v3331_v0  ;;  %p3302_p7 = por %p3301_p6, %p3300_p5 }
 0x998   :  { %p3303_p8 = pnand %p3302_p7, %p3296_p4 }
 0x999   :  { %2974 = vmatpush3.bf16.msra.mxu1 %v3099_v57 }
 0x99a   :  { %2975 = vmatprep.subr.bf16.mxu1 %v3331_v0 }
 0x99d   :  { %2976 = vmatpush3.bf16.msra.mxu1 %v3100_v58 }
 0x99e   :  { %2977 = vmatprep.subr.bf16.mxu1 %v3331_v0 }
 0x9a1   :  { %2978 = vmatpush3.bf16.msra.mxu1 %v3101_v15 }
 0x9a2   :  { %2979 = vmatprep.subr.bf16.mxu1 %v3331_v0 }
 0x9a5   :  { %2980 = vmatpush3.bf16.msra.mxu1 %v3102_v59 }
 0x9a6   :  { %2981 = vmatprep.subr.bf16.mxu1 %v3331_v0 }
 0x9a9   :  { %2982 = vmatpush3.bf16.msra.mxu1 %v3103_v60 }
 0x9aa   :  { %3011 = vmatprep.subr.bf16.mxu1 %v3331_v0 }
 0xa62   :  { %v1656_v28 = vpop.f32.mrb[16].mxu0 }
 0xa63   :  { %1755 = vrot.lane.b32.xlu0 %v1656_v28, %s3344_s30  ;;  %v2957_v29 = vpop.f32.mrb[17].mxu0 }
 0xa66   :  { %v1733_v30 = vpop.f32.mrb[20].mxu1 }
 0xa67   :  { %1757 = vrot.lane.b32.xlu1 %v1733_v30, %s3344_s30  ;;  %v2962_v31 = vpop.f32.mrb[21].mxu1  ;;  %1864 = vrot.lane.b32.xlu0 %v1863_v36, %s3326_s0 }
 0xad5   :  { %v1756_v40 = vpop.permute.xlu0 %1755 }
 0xad6   :  { %v1767_v44 = vsel %vm1766_vm10, %v1764_v43, %v1756_v40 }
 0xad7   :  { %v1769_v50 = vpack.c.bf16 %v1767_v44, %v1767_v44 }
 0xad9   :  { %v1758_v46 = vpop.permute.xlu1 %1757  ;;  %v1784_v10 = vunpack.c.l.b16 %v1769_v50  ;;  %v1865_v8 = vpop.permute.xlu0 %1864 }
 0xada   :  { %v1768_v48 = vsel %vm1766_vm10, %v1765_v47, %v1758_v46 }
 0xadb   :  { %v1770_v51 = vpack.c.bf16 %v1768_v48, %v1768_v48 }
 0xadd   :  { %v1785_v53 = vunpack.c.l.b16 %v1770_v51 }
 0xadf   :  { %v1786_v42 = vrot.slane %v1785_v53, 7 }
 0xae1   :  { %v1788_v54 = vsel %vm1787_vm11, %v1786_v42, %v1784_v10 }
 0xae2   :  { %v1789_v55 = vpack.c.b16 %v1788_v54, %v1788_v54 }
 0xae4   :  { %2968 = vmatmul.mubr.msk.bf16.vlgmr.msra.gmra.mrb[20].mxu0 %vm161_vm1, %v1789_v55 }
 0xae5   :  { %2991 = vmatprep.mubr.msk.bf16.mxu0 %vm3332_vm0, %v3331_v0  ;;  %2988 = vmatpush3.bf16.msra.mxu0 %v3104_v13 }
 0xae6   :  { %2989 = vmatprep.subr.bf16.mxu0 %v3331_v0 }
 0xae9   :  { %2990 = vmatpush3.bf16.msra.mxu0 %v3105_v16 }
 0xaea   :  { %2995 = vmatprep.subr.bf16.mxu0 %v3331_v0 }
 0xbb7   :  { %v1839_v63 = vpop.f32.mrb[20].mxu0 }
 0xbb8   :  { %v1840_v2 = vadd.f32 %v2752_v62, %v1839_v63  ;;  %v2969_v3 = vpop.f32.mrb[21].mxu0 }
 0xbb9   :  { %v1842_v4 = vpop.f32.mrb[22].mxu0 }
 0xbba   :  { %v1845_v5 = vpack.c.bf16 %v1840_v2, %v1840_v2  ;;  %v2970_v7 = vpop.f32.mrb[23].mxu0 }
 0xbbc   :  { %1847 = vrot.lane.b32.xlu1 %v1845_v5, %s3345_s27 }
 0xc2e   :  { %v1848_v9 = vpop.permute.xlu1 %1847 }
 0xc2f   :  { %v1867_v11 = vsel %vm161_vm1, %v3506_v6, %v1848_v9  ;;  %v2757_v6 = vld [vmem:[%s3930_s12] ss:$0 sm:$0xff] }
 0xc30   :  { %v1870_v12 = vsel %vm1868_vm12, %v1867_v11, %v1865_v8 }
 0xc31   :  { %2984 = vmatmul.mubr.msk.bf16.vlgmr.msra.gmra.mrb[24].mxu1 %vm1926_vm13, %v1870_v12 }
 0xc32   :  { %3015 = vmatprep.mubr.msk.bf16.mxu1 %vm3332_vm0, %v3331_v0  ;;  %3012 = vmatpush3.bf16.msra.mxu1 %v3785_v38 }
 0xc33   :  { %3013 = vmatprep.subr.bf16.mxu1 %v3331_v0 }
 0xc36   :  { %3014 = vmatpush3.bf16.msra.mxu1 %v3793_v39 }
 0xc37   :  { %3027 = vmatprep.subr.bf16.mxu1 %v3331_v0 }
 0xd04   :  { %v1963_v18 = vpop.f32.mrb[24].mxu1 }
 0xd05   :  { %v1964_v61 = vadd.f32 %v2757_v6, %v1963_v18  ;;  %v2985_v20 = vpop.f32.mrb[25].mxu1 }
 0xd06   :  { %v1966_v21 = vpop.f32.mrb[26].mxu1 }
 0xd07   :  { %3141 = vtanh.f32 %v1964_v61  ;;  %v2986_v22 = vpop.f32.mrb[27].mxu1 }
 0xd11   :  { %v3142_v23 = vpop.eup %3141 }
 0xd12   :  { %v1979_v1 = vpack.c.bf16 %v3142_v23, %v3142_v23 }
 0xd14   :  { %2992 = vmatmul.mubr.msk.bf16.vlgmr.msra.gmra.mrb[24].mxu0 %vm161_vm1, %v1979_v1 }
 0xd15   :  { %2996 = vmatpush3.bf16.msra.mxu0 %v3104_v13  ;;  %2999 = vmatprep.mubr.msk.bf16.mxu0 %vm3332_vm0, %v3331_v0 }
 0xd16   :  { %2997 = vmatprep.subr.bf16.mxu0 %v3331_v0 }
 0xd19   :  { %2998 = vmatpush3.bf16.msra.mxu0 %v3105_v16 }
 0xd1a   :  { %3003 = vmatprep.subr.bf16.mxu0 %v3331_v0 }
 0xd1c   :  { %3000 = vmatmul.mubr.msk.bf16.vlgmr.msra.gmra.mrb[28].mxu0 %vm161_vm1, %v3106_v37 }
 0xd1d   :  { %3004 = vmatpush3.bf16.msra.mxu0 %v3785_v38  ;;  %3007 = vmatprep.mubr.msk.bf16.mxu0 %vm3332_vm0, %v3331_v0 }
 0xd1e   :  { %3005 = vmatprep.subr.bf16.mxu0 %v3331_v0 }
 0xd21   :  { %3006 = vmatpush3.bf16.msra.mxu0 %v3793_v39 }
 0xd22   :  { %3019 = vmatprep.subr.bf16.mxu0 %v3331_v0 }
 0xde7   :  { %v2035_v25 = vpop.f32.mrb[24].mxu0 }
 0xde8   :  { %v2036_v26 = vadd.f32 %v3777_v24, %v2035_v25  ;;  %v2993_v49 = vpop.f32.mrb[25].mxu0 }
 0xde9   :  { %v2038_v14 = vpop.f32.mrb[26].mxu0 }
 0xdea   :  { %3143 = vtanh.f32 %v2036_v26  ;;  %v2994_v52 = vpop.f32.mrb[27].mxu0  ;;  %v2769_v19 = vmul.f32 -1.442695, %v2036_v26 }
 0xdec   :  { %3145 = vpow2.f32 %v2769_v19 }
 0xdef   :  { %v2109_v45 = vpop.f32.mrb[28].mxu0 }
 0xdf0   :  { %v3001_v46 = vpop.f32.mrb[29].mxu0  ;;  %v3815_v51 = vadd.f32 %v3777_v24, %v2109_v45 }
 0xdf1   :  { %v3805_v47 = vpop.f32.mrb[30].mxu0 }
 0xdf2   :  { %v3002_v48 = vpop.f32.mrb[31].mxu0 }
 0xdf4   :  { %v3144_v17 = vpop.eup %3143 }
 0xdf5   :  { %2050 = vrot.lane.b32.xlu1 %v3144_v17, %s3326_s0 }
 0xdf6   :  { %v3146_v27 = vpop.eup %3145 }
 0xdf7   :  { %v2044_v28 = vadd.f32 1.0, %v3146_v27 }
 0xdf9   :  { %3147 = vrcp.f32 %v2044_v28 }
 0xe03   :  { %v3148_v29 = vpop.eup %3147 }
 0xe04   :  { %v2048_v32 = vmul.f32 0.0, %v3148_v29 }
 0xe67   :  { %v2051_v30 = vpop.permute.xlu1 %2050 }
 0xe68   :  { %v2053_v31 = vmul.f32 %v3148_v29, %v2051_v30 }
 0xe6a   :  { %2055 = vrot.lane.b32.xlu0 %v2053_v31, %s3345_s27 }
 0xedc   :  { %v2056_v33 = vpop.permute.xlu0 %2055 }
 0xedd   :  { %v2058_v35 = vadd.f32 %v2056_v33, %v2048_v32 }
 0xedf   :  { %3149 = vtanh.f32 %v2058_v35 }
 0xee9   :  { %v3150_v40 = vpop.eup %3149 }
 0xeea   :  { %2061 = vrot.lane.b32.xlu1 %v3150_v40, %s3326_s0 }
 0xf5c   :  { %v2062_v41 = vpop.permute.xlu1 %2061 }
 0xf5d   :  { %v2064_v43 = vmul.f32 %v3148_v29, %v2062_v41 }
 0xf5f   :  { %v2116_v44 = vpack.c.bf16 %v2064_v43, %v2064_v43 }
 0xf61   :  { %2118 = vrot.lane.b32.xlu0 %v2116_v44, %s3345_s27 }
 0xfd3   :  { %v2119_v50 = vpop.permute.xlu0 %2118 }
 0xfd4   :  { %3008 = vmatmul.mubr.msk.bf16.vlgmr.msra.gmra.mrb[32].mxu0 %vm161_vm1, %v2119_v50 }
 0xfd5   :  { %3020 = vmatpush3.bf16.msra.mxu0 %v3785_v38  ;;  %3023 = vmatprep.mubr.msk.bf16.mxu0 %vm3332_vm0, %v3331_v0 }
 0xfd6   :  { %3021 = vmatprep.subr.bf16.mxu0 %v3331_v0 }
 0xfd9   :  { %3022 = vmatpush3.bf16.msra.mxu0 %v3793_v39 }
 0xfda   :  { %3035 = vmatprep.subr.bf16.mxu0 %v3331_v0 }
0x10a7   :  { %v2169_v53 = vpop.f32.mrb[32].mxu0 }
0x10a8   :  { %v2175_v10 = vadd.f32 %v2169_v53, %v3815_v51  ;;  %v3009_v42 = vpop.f32.mrb[33].mxu0 }
0x10a9   :  { %v2172_v54 = vpop.f32.mrb[34].mxu0 }
0x10aa   :  { %3151 = vtanh.f32 %v2175_v10  ;;  %v3010_v55 = vpop.f32.mrb[35].mxu0  ;;  %v2775_v36 = vmul.f32 -1.442695, %v2175_v10 }
0x10ac   :  { %3153 = vpow2.f32 %v2775_v36 }
0x10b4   :  { %v3152_v34 = vpop.eup %3151 }
0x10b5   :  { %2185 = vrot.lane.b32.xlu1 %v3152_v34, %s3326_s0 }
0x10b6   :  { %v3154_v56 = vpop.eup %3153 }
0x10b7   :  { %v2179_v57 = vadd.f32 1.0, %v3154_v56 }
0x10b9   :  { %3155 = vrcp.f32 %v2179_v57 }
0x10c3   :  { %v3156_v58 = vpop.eup %3155 }
0x10c4   :  { %v2183_v60 = vmul.f32 %v3156_v58, %v2058_v35 }
0x1127   :  { %v2186_v15 = vpop.permute.xlu1 %2185 }
0x1128   :  { %v2188_v59 = vmul.f32 %v3156_v58, %v2186_v15 }
0x112a   :  { %2190 = vrot.lane.b32.xlu0 %v2188_v59, %s3345_s27 }
0x119c   :  { %v2191_v62 = vpop.permute.xlu0 %2190 }
0x119d   :  { %v2193_v63 = vadd.f32 %v2191_v62, %v2183_v60 }
0x119f   :  { %3157 = vtanh.f32 %v2193_v63  ;;  %v2259_v1 = vrot.slane %v2193_v63, 6 }
0x11a9   :  { %v3158_v2 = vpop.eup %3157 }
0x11aa   :  { %2196 = vrot.lane.b32.xlu1 %v3158_v2, %s3326_s0 }
0x121c   :  { %v2197_v3 = vpop.permute.xlu1 %2196 }
0x121d   :  { %v3821_v4 = vmul.f32 %v3156_v58, %v2197_v3 }
0x121f   :  { %v2200_v5 = vpack.c.bf16 %v3821_v4, %v3821_v4 }
0x1221   :  { %2202 = vrot.lane.b32.xlu0 %v2200_v5, %s3345_s27 }
0x1293   :  { %v2203_v7 = vpop.permute.xlu0 %2202 }
0x1294   :  { %3016 = vmatmul.mubr.msk.bf16.vlgmr.msra.gmra.mrb[28].mxu1 %vm161_vm1, %v2203_v7 }
0x1295   :  { %3028 = vmatpush3.bf16.msra.mxu1 %v3785_v38  ;;  %3031 = vmatprep.mubr.msk.bf16.mxu1 %vm3332_vm0, %v3331_v0 }
0x1296   :  { %3029 = vmatprep.subr.bf16.mxu1 %v3331_v0 }
0x1299   :  { %3030 = vmatpush3.bf16.msra.mxu1 %v3793_v39 }
0x129a   :  { %3043 = vmatprep.subr.bf16.mxu1 %v3331_v0 }
0x1367   :  { %v2241_v8 = vpop.f32.mrb[28].mxu1 }
0x1368   :  { %v2248_v9 = vrot.slane %v2241_v8, 6  ;;  %v3017_v11 = vpop.f32.mrb[29].mxu1 }
0x1369   :  { %v2244_v12 = vpop.f32.mrb[30].mxu1 }
0x136a   :  { %v2250_v13 = vadd.f32 %v2248_v9, %v3815_v51  ;;  %v3018_v16 = vpop.f32.mrb[31].mxu1 }
0x136c   :  { %3159 = vtanh.f32 %v2250_v13  ;;  %v2777_v18 = vmul.f32 -1.442695, %v2250_v13 }
0x136e   :  { %3161 = vpow2.f32 %v2777_v18 }
0x1376   :  { %v3160_v6 = vpop.eup %3159 }
0x1377   :  { %2263 = vrot.lane.b32.xlu1 %v3160_v6, %s3326_s0 }
0x1378   :  { %v3162_v61 = vpop.eup %3161 }
0x1379   :  { %v2254_v20 = vadd.f32 1.0, %v3162_v61 }
0x137b   :  { %3163 = vrcp.f32 %v2254_v20 }
0x1385   :  { %v3164_v21 = vpop.eup %3163 }
0x1386   :  { %v2261_v25 = vmul.f32 %v3164_v21, %v2259_v1  ;;  %v3874_v1 = vadd.f32 %v3777_v24, %v3805_v47 }
0x13e9   :  { %v2264_v22 = vpop.permute.xlu1 %2263 }
0x13ea   :  { %v2266_v23 = vmul.f32 %v3164_v21, %v2264_v22 }
0x13ec   :  { %2268 = vrot.lane.b32.xlu0 %v2266_v23, %s3345_s27 }
0x145e   :  { %v2269_v26 = vpop.permute.xlu0 %2268 }
0x145f   :  { %v2271_v49 = vadd.f32 %v2269_v26, %v2261_v25 }
0x1461   :  { %3165 = vtanh.f32 %v2271_v49  ;;  %v2338_v48 = vrot.slane %v2271_v49, 6 }
0x146b   :  { %v3166_v14 = vpop.eup %3165 }
0x146c   :  { %2274 = vrot.lane.b32.xlu1 %v3166_v14, %s3326_s0 }
0x14de   :  { %v2275_v52 = vpop.permute.xlu1 %2274 }
0x14df   :  { %v2277_v17 = vmul.f32 %v3164_v21, %v2275_v52 }
0x14e1   :  { %v2278_v19 = vpack.c.bf16 %v2277_v17, %v2277_v17  ;;  %v2670_v34 = vsel %vm2669_vm14, %v3821_v4, %v2277_v17 }
0x14e3   :  { %v2280_v27 = vrot.slane %v2278_v19, 1 }
0x14e5   :  { %2281 = vrot.lane.b32.xlu0 %v2280_v27, %s3345_s27 }
0x1557   :  { %v2282_v28 = vpop.permute.xlu0 %2281 }
0x1558   :  { %3024 = vmatmul.mubr.msk.bf16.vlgmr.msra.gmra.mrb[36].mxu0 %vm161_vm1, %v2282_v28 }
0x1559   :  { %3036 = vmatpush3.bf16.msra.mxu0 %v3785_v38  ;;  %3039 = vmatprep.mubr.msk.bf16.mxu0 %vm3332_vm0, %v3331_v0 }
0x155a   :  { %3037 = vmatprep.subr.bf16.mxu0 %v3331_v0 }
0x155d   :  { %3038 = vmatpush3.bf16.msra.mxu0 %v3793_v39 }
0x155e   :  { %3051 = vmatprep.subr.bf16.mxu0 %v3331_v0 }
0x162b   :  { %v2320_v29 = vpop.f32.mrb[36].mxu0 }
0x162c   :  { %v2327_v30 = vrot.slane %v2320_v29, 4  ;;  %v3025_v31 = vpop.f32.mrb[37].mxu0 }
0x162d   :  { %v2323_v32 = vpop.f32.mrb[38].mxu0 }
0x162e   :  { %v2329_v33 = vadd.f32 %v2327_v30, %v3815_v51  ;;  %v3026_v35 = vpop.f32.mrb[39].mxu0 }
0x1630   :  { %3167 = vtanh.f32 %v2329_v33  ;;  %v2779_v40 = vmul.f32 -1.442695, %v2329_v33 }
0x1632   :  { %3169 = vpow2.f32 %v2779_v40 }
0x163a   :  { %v3168_v37 = vpop.eup %3167 }
0x163b   :  { %2342 = vrot.lane.b32.xlu1 %v3168_v37, %s3326_s0 }
0x163c   :  { %v3170_v41 = vpop.eup %3169 }
0x163d   :  { %v2333_v43 = vadd.f32 1.0, %v3170_v41 }
0x163f   :  { %3171 = vrcp.f32 %v2333_v43 }
0x1649   :  { %v3172_v44 = vpop.eup %3171 }
0x164a   :  { %v2340_v50 = vmul.f32 %v3172_v44, %v2338_v48 }
0x16ad   :  { %v2343_v45 = vpop.permute.xlu1 %2342 }
0x16ae   :  { %v2345_v46 = vmul.f32 %v3172_v44, %v2343_v45 }
0x16b0   :  { %2347 = vrot.lane.b32.xlu0 %v2345_v46, %s3345_s27 }
0x1722   :  { %v2348_v53 = vpop.permute.xlu0 %2347 }
0x1723   :  { %v2350_v10 = vadd.f32 %v2348_v53, %v2340_v50 }
0x1725   :  { %3173 = vtanh.f32 %v2350_v10  ;;  %v2417_v12 = vrot.slane %v2350_v10, 6 }
0x172f   :  { %v3174_v42 = vpop.eup %3173 }
0x1730   :  { %2353 = vrot.lane.b32.xlu1 %v3174_v42, %s3326_s0 }
0x17a2   :  { %v2354_v54 = vpop.permute.xlu1 %2353 }
0x17a3   :  { %v2356_v55 = vmul.f32 %v3172_v44, %v2354_v54 }
0x17a5   :  { %v2357_v36 = vpack.c.bf16 %v2356_v55, %v2356_v55  ;;  %v2672_v56 = vsel %vm2671_vm15, %v2670_v34, %v2356_v55 }
0x17a7   :  { %v2359_v57 = vrot.slane %v2357_v36, 2 }
0x17a9   :  { %2360 = vrot.lane.b32.xlu0 %v2359_v57, %s3345_s27 }
0x181b   :  { %v2361_v58 = vpop.permute.xlu0 %2360 }
0x181c   :  { %3032 = vmatmul.mubr.msk.bf16.vlgmr.msra.gmra.mrb[32].mxu1 %vm161_vm1, %v2361_v58 }
0x181d   :  { %3044 = vmatpush3.bf16.msra.mxu1 %v3785_v38  ;;  %3047 = vmatprep.mubr.msk.bf16.mxu1 %vm3332_vm0, %v3331_v0 }
0x181e   :  { %3045 = vmatprep.subr.bf16.mxu1 %v3331_v0 }
0x1821   :  { %3046 = vmatpush3.bf16.msra.mxu1 %v3793_v39 }
0x18ef   :  { %v2399_v15 = vpop.f32.mrb[32].mxu1 }
0x18f0   :  { %v2406_v59 = vrot.slane %v2399_v15, 2  ;;  %v3033_v60 = vpop.f32.mrb[33].mxu1 }
0x18f1   :  { %v2402_v62 = vpop.f32.mrb[34].mxu1 }
0x18f2   :  { %v2408_v63 = vadd.f32 %v2406_v59, %v3815_v51  ;;  %v3034_v2 = vpop.f32.mrb[35].mxu1 }
0x18f4   :  { %3175 = vtanh.f32 %v2408_v63  ;;  %v2781_v4 = vmul.f32 -1.442695, %v2408_v63 }
0x18f6   :  { %3177 = vpow2.f32 %v2781_v4 }
0x18fe   :  { %v3176_v3 = vpop.eup %3175 }
0x18ff   :  { %2421 = vrot.lane.b32.xlu1 %v3176_v3, %s3326_s0 }
0x1900   :  { %v3178_v5 = vpop.eup %3177 }
0x1901   :  { %v2412_v7 = vadd.f32 1.0, %v3178_v5 }
0x1903   :  { %3179 = vrcp.f32 %v2412_v7 }
0x190d   :  { %v3180_v8 = vpop.eup %3179 }
0x190e   :  { %v2419_v13 = vmul.f32 %v3180_v8, %v2417_v12 }
0x1971   :  { %v2422_v9 = vpop.permute.xlu1 %2421 }
0x1972   :  { %v2424_v11 = vmul.f32 %v3180_v8, %v2422_v9 }
0x1974   :  { %2426 = vrot.lane.b32.xlu0 %v2424_v11, %s3345_s27 }
0x19e6   :  { %v2427_v16 = vpop.permute.xlu0 %2426 }
0x19e7   :  { %v2429_v6 = vadd.f32 %v2427_v16, %v2419_v13 }
0x19e9   :  { %3181 = vtanh.f32 %v2429_v6  ;;  %v2493_v24 = vrot.slane %v2429_v6, 6 }
0x19f3   :  { %v3182_v51 = vpop.eup %3181 }
0x19f4   :  { %2432 = vrot.lane.b32.xlu1 %v3182_v51, %s3326_s0 }
0x1a66   :  { %v2433_v18 = vpop.permute.xlu1 %2432 }
0x1a67   :  { %v2435_v61 = vmul.f32 %v3180_v8, %v2433_v18 }
0x1a69   :  { %v2436_v20 = vpack.c.bf16 %v2435_v61, %v2435_v61  ;;  %v3863_v21 = vsel %vm2673_vm2, %v2672_v56, %v2435_v61 }
0x1a6a   :  { %v2790_v18 = vpack.c.bf16 %v3863_v21, %v3863_v21 }
0x1a6b   :  { %v2438_v22 = vrot.slane %v2436_v20, 3 }
0x1a6d   :  { %2439 = vrot.lane.b32.xlu0 %v2438_v22, %s3345_s27 }
0x1adf   :  { %v2440_v23 = vpop.permute.xlu0 %2439 }
0x1ae0   :  { %3040 = vmatmul.mubr.msk.bf16.vlgmr.msra.gmra.mrb[40].mxu0 %vm161_vm1, %v2440_v23 }
0x1ae1   :  { %3052 = vmatpush3.bf16.msra.mxu0 %v3785_v38  ;;  %3055 = vmatprep.mubr.msk.bf16.mxu0 %vm3332_vm0, %v3331_v0  ;;  %vm2689_vm0 = vcmask 257024  }
0x1ae2   :  { %3053 = vmatprep.subr.bf16.mxu0 %v3331_v0 }
0x1ae5   :  { %3054 = vmatpush3.bf16.msra.mxu0 %v3793_v39 }
0x1bb3   :  { %v2478_v25 = vpop.f32.mrb[40].mxu0 }
0x1bb4   :  { %v2484_v26 = vadd.f32 %v2478_v25, %v3874_v1  ;;  %v3041_v49 = vpop.f32.mrb[41].mxu0 }
0x1bb5   :  { %v2481_v14 = vpop.f32.mrb[42].mxu0 }
0x1bb6   :  { %3183 = vtanh.f32 %v2484_v26  ;;  %v3042_v52 = vpop.f32.mrb[43].mxu0  ;;  %v2783_v38 = vmul.f32 -1.442695, %v2484_v26 }
0x1bb8   :  { %3185 = vpow2.f32 %v2783_v38 }
0x1bc0   :  { %v3184_v17 = vpop.eup %3183 }
0x1bc1   :  { %2497 = vrot.lane.b32.xlu1 %v3184_v17, %s3326_s0 }
0x1bc2   :  { %v3186_v19 = vpop.eup %3185 }
0x1bc3   :  { %v2488_v0 = vadd.f32 1.0, %v3186_v19 }
0x1bc5   :  { %3187 = vrcp.f32 %v2488_v0 }
0x1bcf   :  { %v3188_v39 = vpop.eup %3187 }
0x1bd0   :  { %v2495_v47 = vmul.f32 %v3188_v39, %v2493_v24 }
0x1c33   :  { %v2498_v27 = vpop.permute.xlu1 %2497 }
0x1c34   :  { %v2500_v28 = vmul.f32 %v3188_v39, %v2498_v27 }
0x1c36   :  { %2502 = vrot.lane.b32.xlu0 %v2500_v28, %s3345_s27 }
0x1ca8   :  { %v2503_v29 = vpop.permute.xlu0 %2502 }
0x1ca9   :  { %v2505_v30 = vadd.f32 %v2503_v29, %v2495_v47 }
0x1cab   :  { %3189 = vtanh.f32 %v2505_v30  ;;  %v2571_v34 = vrot.slane %v2505_v30, 6 }
0x1cb5   :  { %v3190_v31 = vpop.eup %3189 }
0x1cb6   :  { %2508 = vrot.lane.b32.xlu1 %v3190_v31, %s3326_s0 }
0x1d28   :  { %v2509_v32 = vpop.permute.xlu1 %2508 }
0x1d29   :  { %v3880_v33 = vmul.f32 %v3188_v39, %v2509_v32 }
0x1d2b   :  { %v2512_v35 = vpack.c.bf16 %v3880_v33, %v3880_v33 }
0x1d2d   :  { %2514 = vrot.lane.b32.xlu0 %v2512_v35, %s3345_s27 }
0x1d9f   :  { %v2515_v37 = vpop.permute.xlu0 %2514 }
0x1da0   :  { %3048 = vmatmul.mubr.msk.bf16.vlgmr.msra.gmra.mrb[36].mxu1 %vm161_vm1, %v2515_v37 }
0x1e73   :  { %v2553_v40 = vpop.f32.mrb[36].mxu1 }
0x1e74   :  { %v2560_v41 = vrot.slane %v2553_v40, 6  ;;  %v3049_v43 = vpop.f32.mrb[37].mxu1 }
0x1e75   :  { %v2556_v44 = vpop.f32.mrb[38].mxu1 }
0x1e76   :  { %v2562_v45 = vadd.f32 %v2560_v41, %v3874_v1  ;;  %v3050_v46 = vpop.f32.mrb[39].mxu1 }
0x1e78   :  { %3191 = vtanh.f32 %v2562_v45  ;;  %v2785_v50 = vmul.f32 -1.442695, %v2562_v45 }
0x1e7a   :  { %3193 = vpow2.f32 %v2785_v50 }
0x1e82   :  { %v3192_v48 = vpop.eup %3191 }
0x1e83   :  { %2575 = vrot.lane.b32.xlu1 %v3192_v48, %s3326_s0 }
0x1e84   :  { %v3194_v53 = vpop.eup %3193 }
0x1e85   :  { %v2566_v10 = vadd.f32 1.0, %v3194_v53 }
0x1e87   :  { %3195 = vrcp.f32 %v2566_v10 }
0x1e91   :  { %v3196_v42 = vpop.eup %3195 }
0x1e92   :  { %v2573_v36 = vmul.f32 %v3196_v42, %v2571_v34 }
0x1ef5   :  { %v2576_v54 = vpop.permute.xlu1 %2575 }
0x1ef6   :  { %v2578_v55 = vmul.f32 %v3196_v42, %v2576_v54 }
0x1ef8   :  { %2580 = vrot.lane.b32.xlu0 %v2578_v55, %s3345_s27 }
0x1f6a   :  { %v2581_v56 = vpop.permute.xlu0 %2580 }
0x1f6b   :  { %v2583_v57 = vadd.f32 %v2581_v56, %v2573_v36 }
0x1f6d   :  { %3197 = vtanh.f32 %v2583_v57  ;;  %v2650_v61 = vrot.slane %v2583_v57, 6 }
0x1f77   :  { %v3198_v58 = vpop.eup %3197 }
0x1f78   :  { %2586 = vrot.lane.b32.xlu1 %v3198_v58, %s3326_s0 }
0x1fea   :  { %v2587_v15 = vpop.permute.xlu1 %2586 }
0x1feb   :  { %v2589_v59 = vmul.f32 %v3196_v42, %v2587_v15 }
0x1fed   :  { %v2590_v60 = vpack.c.bf16 %v2589_v59, %v2589_v59  ;;  %v2675_v14 = vsel %vm2669_vm14, %v3880_v33, %v2589_v59 }
0x1fef   :  { %v2592_v62 = vrot.slane %v2590_v60, 1 }
0x1ff1   :  { %2593 = vrot.lane.b32.xlu0 %v2592_v62, %s3345_s27 }
0x2063   :  { %v2594_v63 = vpop.permute.xlu0 %2593 }
0x2064   :  { %3056 = vmatmul.mubr.msk.bf16.vlgmr.msra.gmra.mrb[44].mxu0 %vm161_vm1, %v2594_v63  ;;  %vm2691_vm1 = vcmask 256000  }
0x2137   :  { %v2632_v2 = vpop.f32.mrb[44].mxu0 }
0x2138   :  { %v2639_v3 = vrot.slane %v2632_v2, 4  ;;  %v3057_v4 = vpop.f32.mrb[45].mxu0 }
0x2139   :  { %v2635_v5 = vpop.f32.mrb[46].mxu0 }
0x213a   :  { %v2641_v7 = vadd.f32 %v2639_v3, %v3874_v1  ;;  %v3058_v8 = vpop.f32.mrb[47].mxu0 }
0x213c   :  { %3199 = vtanh.f32 %v2641_v7  ;;  %v2787_v11 = vmul.f32 -1.442695, %v2641_v7 }
0x213e   :  { %3201 = vpow2.f32 %v2787_v11 }
0x2146   :  { %v3200_v9 = vpop.eup %3199 }
0x2147   :  { %2654 = vrot.lane.b32.xlu1 %v3200_v9, %s3326_s0 }
0x2148   :  { %v3202_v12 = vpop.eup %3201 }
0x2149   :  { %v2645_v13 = vadd.f32 1.0, %v3202_v12 }
0x214b   :  { %3203 = vrcp.f32 %v2645_v13 }
0x2155   :  { %v3204_v16 = vpop.eup %3203 }
0x2156   :  { %v2652_v20 = vmul.f32 %v3204_v16, %v2650_v61 }
0x21b9   :  { %v2655_v6 = vpop.permute.xlu1 %2654 }
0x21ba   :  { %v2657_v51 = vmul.f32 %v3204_v16, %v2655_v6 }
0x21bc   :  { %2659 = vrot.lane.b32.xlu0 %v2657_v51, %s3345_s27 }
0x21c0   :  { %2683 = vrot.lane.b32.xlu0 %v2790_v18, %s3345_s27 }
0x222e   :  { %v2660_v22 = vpop.permute.xlu0 %2659 }
0x222f   :  { %v2662_v23 = vadd.f32 %v2660_v22, %v2652_v20 }
0x2231   :  { %3205 = vtanh.f32 %v2662_v23 }
0x2232   :  { %v2684_v1 = vpop.permute.xlu0 %2683 }
0x2233   :  { %2690 = vst.msk [vmem:[#allocation10] sm:$0xf] %vm2689_vm0, %v2684_v1 }
0x223b   :  { %v3206_v25 = vpop.eup %3205 }
0x223c   :  { %2665 = vrot.lane.b32.xlu1 %v3206_v25, %s3326_s0 }
0x22ae   :  { %v2666_v26 = vpop.permute.xlu1 %2665 }
0x22af   :  { %v2668_v49 = vmul.f32 %v3204_v16, %v2666_v26 }
0x22b1   :  { %v2676_v21 = vsel %vm2671_vm15, %v2675_v14, %v2668_v49 }
0x22b2   :  { %v2791_v52 = vpack.c.bf16 %v2676_v21, %v2676_v21 }
0x22b4   :  { %2685 = vrot.lane.b32.xlu1 %v2791_v52, %s3345_s27 }
0x2326   :  { %v2686_v17 = vpop.permute.xlu1 %2685 }
0x2327   :  { %2692 = vst.msk [vmem:[#allocation10 + $0x4] sm:$0x7] %vm2691_vm1, %v2686_v17 }
0x2328   :  { %3306 = shalt.err (!%p3303_p8)
}
0x2329   :  { %s3941_s20 = sld [smem:[#allocation16_spill]] }
0x232f   :  { %s3307_s5 = scalar_lea.hbm %s3941_s20, 128 }
0x2330   :  { %p3308_p9 = scmp.ne.s32.totalorder %s3941_s20, %s3307_s5  ;;  %p3311_p10 = scmp.lt.u32.totalorder %s3307_s5, %s3941_s20 }
0x2332   :  { %p3313_p11 = pnand %p3311_p10, %p3308_p9 }
0x2334   :  { %3316 = shalt.err (!%p3313_p11)
}
0x2335   :  { %2704 = dma.vmem_to_hbm [thread:$0]  %s2699_s4, 128, %s3941_s20, [#allocation4], %s3326_s0, %s3326_s0, %s3327_s17  }
0x2336   :  { %3323 = dma.done.wait [#allocation4], 128  }
0x2337   :  { %3324 = vsyncadd [#allocation4], 4294967168 }
0x2338   :  { %2708 = vsyncpa [#allocation3], 1 }
0x2339   :  { %2709 = vsyncpa [#allocation6], 1 }
0x233a   :  { %2710 = vsyncpa [#allocation9], 1 }
0x233b   :  { %2711 = vsyncpa [#allocation4], 1 }

</bundles_post_ra>
